<compile_context>
chip_gen: v7x
topology: tpu7x:2x2x1
jax: 0.10.0
libtpu: 0.0.40
codegen_flags: <defaults>
</compile_context>

<pallas_src>
import functools

import jax
import jax.numpy as jnp
from jax.experimental import pallas as pl
from jax.experimental.pallas import tpu as pltpu

_LANE = 128
_ROW_ALIGN = 16  # bf16 packs 16 rows / (8,128) f32 tile pair; cheap insurance


def _round_up(x, m):
    return (x + m - 1) // m * m


def _chip_info():
    """Returns (tensorcores_per_chip, vmem_capacity_bytes) with safe fallbacks."""
    kind = ""
    try:
        kind = jax.devices()[0].device_kind.lower()
    except Exception:  # pragma: no cover - defensive
        pass
    is_v7 = ("v7" in kind) or ("tpu7" in kind)
    num_tc = 2 if is_v7 else 1
    try:
        vmem_cap = int(pltpu.get_tpu_info().vmem_capacity_bytes)
    except Exception:  # pragma: no cover - defensive
        vmem_cap = (64 << 20) if is_v7 else (128 << 20)
    return num_tc, vmem_cap


# ---------------------------------------------------------------------------
# Parameter preparation (done ONCE, outside the per-call forward path)
# ---------------------------------------------------------------------------
def prepare_params(params):
    """Pad weights/biases to lane-dense (multiple-of-128) dims and cast weights
    to bf16.  Zero padding is numerically exact (padded rows/cols contribute 0).

    Returns (padded_param_dict, dims) where dims = (F, H, L, Fp, Hp, Lp).
    """
    F, H = params["w1"].shape
    L = params["w2"].shape[1]
    Fp, Hp, Lp = _round_up(F, _LANE), _round_up(H, _LANE), _round_up(L, _LANE)

    def pad2(a, rows, cols, dtype):
        a = jnp.asarray(a, dtype)
        return jnp.pad(a, ((0, rows - a.shape[0]), (0, cols - a.shape[1])))

    bf = jnp.bfloat16
    padded = {
        "w1": pad2(params["w1"], Fp, Hp, bf), "b1": pad2(params["b1"], 1, Hp, jnp.float32),
        "w2": pad2(params["w2"], Hp, Lp, bf), "b2": pad2(params["b2"], 1, Lp, jnp.float32),
        "w3": pad2(params["w3"], Lp, Hp, bf), "b3": pad2(params["b3"], 1, Hp, jnp.float32),
        "w4": pad2(params["w4"], Hp, Fp, bf), "b4": pad2(params["b4"], 1, Fp, jnp.float32),
    }
    return padded, (F, H, L, Fp, Hp, Lp)


# ---------------------------------------------------------------------------
# Kernel
# ---------------------------------------------------------------------------
def _ae_kernel(x_ref,
               w1_ref, b1_ref,
               w2_ref, b2_ref,
               w3_ref, b3_ref,
               w4_ref, b4_ref,
               pred_ref, enc_ref):
    """Full autoencoder forward on one batch tile.

    x_ref    : (TB, Fp)  f32 flattened input tile (cast to bf16 in-kernel)
    w1,b1    : (Fp, Hp) bf16, (1, Hp) f32    encoder layer 1
    w2,b2    : (Hp, Lp) bf16, (1, Lp) f32    encoder layer 2 (latent)
    w3,b3    : (Lp, Hp) bf16, (1, Hp) f32    decoder layer 1
    w4,b4    : (Hp, Fp) bf16, (1, Fp) f32    decoder layer 2 (reconstruction)
    pred_ref : (TB, Fp) f32  reconstruction tile
    enc_ref  : (TB, Lp) f32  encoded-features tile
    """
    # bf16 cast on the VPU; hidden under the input block DMA.
    x = x_ref[...].astype(w1_ref.dtype)

    # dot -> +bias -> ReLU -> cast kept fused per layer (f32 MXU accumulation,
    # bf16 between layers) so the VPU epilogue stays filler under the MXU.
    h1 = jnp.dot(x, w1_ref[...], preferred_element_type=jnp.float32) + b1_ref[...]
    h1 = jnp.maximum(h1, 0.0).astype(w2_ref.dtype)

    z = jnp.dot(h1, w2_ref[...], preferred_element_type=jnp.float32) + b2_ref[...]
    z = jnp.maximum(z, 0.0)
    # Write the latent immediately: ends z's f32 live range before the decoder
    # matmuls (keeps vreg pressure down at large batch tiles).
    enc_ref[...] = z.astype(enc_ref.dtype)

    d1 = jnp.dot(z.astype(w3_ref.dtype), w3_ref[...],
                 preferred_element_type=jnp.float32) + b3_ref[...]
    d1 = jnp.maximum(d1, 0.0).astype(w4_ref.dtype)

    out = jnp.dot(d1, w4_ref[...], preferred_element_type=jnp.float32) + b4_ref[...]
    pred_ref[...] = out.astype(pred_ref.dtype)


# ---------------------------------------------------------------------------
# Forward
# ---------------------------------------------------------------------------
@functools.partial(
    jax.jit,
    static_argnames=("dims", "num_tc", "vmem_cap", "max_tile_b",
                     "single_buffer_weights"))
def _forward_impl(data, padded, *, dims, num_tc, vmem_cap, max_tile_b,
                  single_buffer_weights):
    B, D, T = data.shape
    F, H, L, Fp, Hp, Lp = dims
    assert D * T == F, "parameter shapes do not match data [B, D, T]"

    # ---- generation-aware batch tiling ------------------------------------
    # v7x (2 TCs): even number of grid steps so both cores get work.
    # v5e/v6e (1 TC): grid is a sequential loop -> collapse to as few steps as
    # the VMEM budget allows (per-step overhead dominates this tiny kernel).
    if num_tc >= 2:
        steps = max(num_tc, num_tc * pl.cdiv(B, num_tc * max_tile_b))
    else:
        steps = max(1, pl.cdiv(B, max_tile_b))
    tb = _round_up(pl.cdiv(B, steps), _ROW_ALIGN)
    Bp = steps * tb

    # ---- input: no wrapper pad/cast pass unless actually required ----------
    x = data.reshape(B, F)  # metadata-only reshape
    if (Bp, Fp) != (B, F):
        x = jnp.pad(x, ((0, Bp - B), (0, Fp - F)))

    # ---- VMEM budget --------------------------------------------------------
    w_bufs = 1 if single_buffer_weights else 2
    weight_bytes = (Fp * Hp + Hp * Lp + Lp * Hp + Hp * Fp) * 2        # bf16
    bias_bytes = (2 * Hp + Lp + Fp) * 4
    io_bytes = tb * (Fp * 4 + Fp * 4 + Lp * 4)                        # x, pred, enc
    interm_bytes = tb * (Hp + Lp + Hp + Fp) * 4                       # h1, z, d1, out
    vmem_est = w_bufs * (weight_bytes + bias_bytes) + 2 * io_bytes + interm_bytes
    vmem_limit = int(min(max(int(vmem_est * 1.25) + (2 << 20), 16 << 20),
                         int(0.8 * vmem_cap)))
    # TODO(synk): at spectrogram-scale F where w1/w4 exceed ~0.8*vmem_cap
    # (threshold derived per-chip: ~51 MiB on v7x, ~100 MiB on v5e/v6e), add a
    # K-tiled grid axis over F with an f32 accumulator scratch and pl.when
    # init/finalize (reduction axis last, marked "arbitrary").

    # ---- specs --------------------------------------------------------------
    x_spec = pl.BlockSpec((tb, Fp), lambda i: (i, 0))
    pred_spec = pl.BlockSpec((tb, Fp), lambda i: (i, 0))
    enc_spec = pl.BlockSpec((tb, Lp), lambda i: (i, 0))

    wkw = {"pipeline_mode": pl.Buffered(1)} if single_buffer_weights else {}

    def rep_spec(shape):
        # Constant index_map: block fetched once, reused for every batch tile.
        # Single-buffered when supported (block never changes).
        return pl.BlockSpec(shape, lambda i: (0, 0), **wkw)

    flops = 2 * Bp * (Fp * Hp + Hp * Lp + Lp * Hp + Hp * Fp)
    bytes_accessed = (Bp * Fp * 4 + weight_bytes + bias_bytes
                      + Bp * Fp * 4 + Bp * Lp * 4)

    pred_flat, enc = pl.pallas_call(
        _ae_kernel,
        out_shape=(
            jax.ShapeDtypeStruct((Bp, Fp), jnp.float32),
            jax.ShapeDtypeStruct((Bp, Lp), jnp.float32),
        ),
        grid_spec=pltpu.PrefetchScalarGridSpec(
            num_scalar_prefetch=0,
            grid=(steps,),
            in_specs=[
                x_spec,
                rep_spec((Fp, Hp)), rep_spec((1, Hp)),
                rep_spec((Hp, Lp)), rep_spec((1, Lp)),
                rep_spec((Lp, Hp)), rep_spec((1, Hp)),
                rep_spec((Hp, Fp)), rep_spec((1, Fp)),
            ],
            out_specs=[pred_spec, enc_spec],
        ),
        compiler_params=pltpu.CompilerParams(
            dimension_semantics=("parallel",),
            vmem_limit_bytes=vmem_limit,
        ),
        cost_estimate=pl.CostEstimate(
            flops=flops, transcendentals=0, bytes_accessed=bytes_accessed),
    )(x, padded["w1"], padded["b1"], padded["w2"], padded["b2"],
      padded["w3"], padded["b3"], padded["w4"], padded["b4"])

    # Slice only when actually padded (avoids an extra HBM pass over pred).
    if (Bp, Fp) != (B, F):
        pred_flat = pred_flat[:B, :F]
    pred = pred_flat.reshape(B, D, T)
    encoded = enc if (Bp, Lp) == (B, L) else enc[:B, :L]
    return pred, encoded


def representation_pretrain_forward(data, prepared, *, max_tile_b=512,
                                    single_buffer_weights=True):
    """Forward pass of RepresentationPretrain.

    Args:
      data:     [B, D, T] float32 (D = freqlen, T = seqlen)
      prepared: output of prepare_params(params) (padded bf16 weights, f32 biases)
    Returns:
      (predicted [B, D, T] f32, encoded [B, latent] f32)
    """
    padded, dims = prepared
    num_tc, vmem_cap = _chip_info()
    return _forward_impl(data, padded, dims=dims, num_tc=num_tc,
                         vmem_cap=vmem_cap, max_tile_b=max_tile_b,
                         single_buffer_weights=single_buffer_weights)


# ---------------------------------------------------------------------------
# Parameter init + references
# ---------------------------------------------------------------------------
def init_params(key, freqlen, seqlen, hidden, latent):
    """Deterministic synthetic parameter init (PyTorch-Linear-like uniform).
    Weights stored [in, out]."""
    F = freqlen * seqlen
    ks = jax.random.split(key, 8)

    def linear(kw, kb, fan_in, fan_out):
        bound = 1.0 / float(fan_in) ** 0.5
        w = jax.random.uniform(kw, (fan_in, fan_out), jnp.float32, -bound, bound)
        b = jax.random.uniform(kb, (1, fan_out), jnp.float32, -bound, bound)
        return w, b

    w1, b1 = linear(ks[0], ks[1], F, hidden)
    w2, b2 = linear(ks[2], ks[3], hidden, latent)
    w3, b3 = linear(ks[4], ks[5], latent, hidden)
    w4, b4 = linear(ks[6], ks[7], hidden, F)
    return {"w1": w1, "b1": b1, "w2": w2, "b2": b2,
            "w3": w3, "b3": b3, "w4": w4, "b4": b4}


def _reference_forward_bf16(data, params):
    """Pure-JAX reference matching the kernel numerics (bf16 ops, f32 acc)."""
    B, D, T = data.shape
    bf = jnp.bfloat16
    x = data.reshape(B, D * T).astype(bf)
    h1 = jnp.maximum(jnp.dot(x, params["w1"].astype(bf),
                             preferred_element_type=jnp.float32) + params["b1"], 0.0)
    z = jnp.maximum(jnp.dot(h1.astype(bf), params["w2"].astype(bf),
                            preferred_element_type=jnp.float32) + params["b2"], 0.0)
    d1 = jnp.maximum(jnp.dot(z.astype(bf), params["w3"].astype(bf),
                             preferred_element_type=jnp.float32) + params["b3"], 0.0)
    out = jnp.dot(d1.astype(bf), params["w4"].astype(bf),
                  preferred_element_type=jnp.float32) + params["b4"]
    return out.reshape(B, D, T), z


def _reference_forward_f32(data, params):
    """Full-precision reference of the original module forward."""
    B, D, T = data.shape
    x = data.reshape(B, D * T)
    h1 = jnp.maximum(x @ params["w1"] + params["b1"], 0.0)
    z = jnp.maximum(h1 @ params["w2"] + params["b2"], 0.0)
    d1 = jnp.maximum(z @ params["w3"] + params["b3"], 0.0)
    out = d1 @ params["w4"] + params["b4"]
    return out.reshape(B, D, T), z


if __name__ == "__main__":
    # Small shapes consistent with the module's forward ([B, D, T]).
    # F = D*T = 128 is already lane-dense; HIDDEN/LATENT get zero-padded to 128
    # inside prepare_params. B=256 -> 1 grid step on v5e/v6e, 2 steps on v7x.
    B, FREQLEN, SEQLEN = 256, 16, 8      # data: [256, 16, 8] -> F = 128
    HIDDEN, LATENT = 64, 32

    key = jax.random.PRNGKey(0)
    k_data, k_param = jax.random.split(key)

    data = jax.random.normal(k_data, (B, FREQLEN, SEQLEN), dtype=jnp.float32)
    params = init_params(k_param, FREQLEN, SEQLEN, HIDDEN, LATENT)

    # One-time weight padding/cast (outside the per-call forward path).
    prepared = prepare_params(params)
    jax.block_until_ready(prepared[0])

    try:
        pred, encoded = representation_pretrain_forward(data, prepared)
        jax.block_until_ready((pred, encoded))
    except Exception:
        # Some jax versions reject pipeline_mode=pl.Buffered(1) on pallas_call
        # block specs; fall back to default double-buffered weight blocks.
        pred, encoded = representation_pretrain_forward(
            data, prepared, single_buffer_weights=False)
        jax.block_until_ready((pred, encoded))

    assert pred.shape == (B, FREQLEN, SEQLEN)
    assert encoded.shape == (B, LATENT)

    # Tight check against a bf16-matched reference (same numerics as kernel).
    ref_pred_bf, ref_enc_bf = _reference_forward_bf16(data, params)
    assert jnp.allclose(pred, ref_pred_bf, atol=1e-2, rtol=1e-2)
    assert jnp.allclose(encoded, ref_enc_bf, atol=1e-2, rtol=1e-2)

    # Loose check against the full-f32 module semantics.
    ref_pred, ref_enc = _reference_forward_f32(data, params)
    assert jnp.allclose(pred, ref_pred, atol=1e-1, rtol=1e-1)
    assert jnp.allclose(encoded, ref_enc, atol=1e-1, rtol=1e-1)

    # TODO(synk): load_model / add_state_to_save / get_feature_dimension are
    # host-side checkpoint & config introspection with no Pallas equivalent.
    print("KERNEL_OK")
</pallas_src>

<mosaic_0001>
module attributes {stable_mosaic.version = 11 : i64} {
  func.func @_ae_kernel(%arg0: i32, %arg1: memref<256x128xf32, #tpu.memory_space<vmem>>, %arg2: memref<128x128xbf16, #tpu.memory_space<vmem>>, %arg3: memref<1x128xf32, #tpu.memory_space<vmem>>, %arg4: memref<128x128xbf16, #tpu.memory_space<vmem>>, %arg5: memref<1x128xf32, #tpu.memory_space<vmem>>, %arg6: memref<128x128xbf16, #tpu.memory_space<vmem>>, %arg7: memref<1x128xf32, #tpu.memory_space<vmem>>, %arg8: memref<128x128xbf16, #tpu.memory_space<vmem>>, %arg9: memref<1x128xf32, #tpu.memory_space<vmem>>, %arg10: memref<256x128xf32, #tpu.memory_space<vmem>>, %arg11: memref<256x128xf32, #tpu.memory_space<vmem>>) attributes {dimension_semantics = [#tpu.dimension_semantics<parallel>], iteration_bounds = array<i64: 1>, scalar_prefetch = 0 : i64, scratch_operands = 0 : i64, tpu.core_type = #tpu.core_type<tc>, window_params = [{transform_indices = @transform_0, window_bounds = array<i64: 256, 128>}, {pipeline_mode = #tpu.pipeline_mode<synchronous>, transform_indices = @transform_1, window_bounds = array<i64: 128, 128>}, {pipeline_mode = #tpu.pipeline_mode<synchronous>, transform_indices = @transform_2, window_bounds = array<i64: 1, 128>}, {pipeline_mode = #tpu.pipeline_mode<synchronous>, transform_indices = @transform_3, window_bounds = array<i64: 128, 128>}, {pipeline_mode = #tpu.pipeline_mode<synchronous>, transform_indices = @transform_4, window_bounds = array<i64: 1, 128>}, {pipeline_mode = #tpu.pipeline_mode<synchronous>, transform_indices = @transform_5, window_bounds = array<i64: 128, 128>}, {pipeline_mode = #tpu.pipeline_mode<synchronous>, transform_indices = @transform_6, window_bounds = array<i64: 1, 128>}, {pipeline_mode = #tpu.pipeline_mode<synchronous>, transform_indices = @transform_7, window_bounds = array<i64: 128, 128>}, {pipeline_mode = #tpu.pipeline_mode<synchronous>, transform_indices = @transform_8, window_bounds = array<i64: 1, 128>}, {transform_indices = @transform_9, window_bounds = array<i64: 256, 128>}, {transform_indices = @transform_10, window_bounds = array<i64: 256, 128>}]} {
    %c0 = arith.constant 0 : index
    %c0_0 = arith.constant 0 : index
    %0 = vector.load %arg1[%c0, %c0_0] : memref<256x128xf32, #tpu.memory_space<vmem>>, vector<256x128xf32>
    %1 = arith.truncf %0 : vector<256x128xf32> to vector<256x128xbf16>
    %c0_1 = arith.constant 0 : index
    %c0_2 = arith.constant 0 : index
    %2 = vector.load %arg2[%c0_1, %c0_2] : memref<128x128xbf16, #tpu.memory_space<vmem>>, vector<128x128xbf16>
    %cst = arith.constant dense<0.000000e+00> : vector<256x128xf32>
    %3 = tpu.matmul %1, %2, %cst {dimension_numbers = #tpu.dot_dimension_numbers<[1], [0], [0], [1], [0, 0, 1, 1], [], []>} : vector<256x128xbf16>, vector<128x128xbf16>, vector<256x128xf32> -> vector<256x128xf32>
    %c0_3 = arith.constant 0 : index
    %c0_4 = arith.constant 0 : index
    %4 = vector.load %arg3[%c0_3, %c0_4] : memref<1x128xf32, #tpu.memory_space<vmem>>, vector<1x128xf32>
    %5 = vector.broadcast %4 : vector<1x128xf32> to vector<256x128xf32>
    %6 = arith.addf %3, %5 : vector<256x128xf32>
    %cst_5 = arith.constant 0.000000e+00 : f32
    %7 = vector.broadcast %cst_5 : f32 to vector<256x128xf32>
    %8 = arith.maximumf %6, %7 : vector<256x128xf32>
    %9 = arith.truncf %8 : vector<256x128xf32> to vector<256x128xbf16>
    %c0_6 = arith.constant 0 : index
    %c0_7 = arith.constant 0 : index
    %10 = vector.load %arg4[%c0_6, %c0_7] : memref<128x128xbf16, #tpu.memory_space<vmem>>, vector<128x128xbf16>
    %cst_8 = arith.constant dense<0.000000e+00> : vector<256x128xf32>
    %11 = tpu.matmul %9, %10, %cst_8 {dimension_numbers = #tpu.dot_dimension_numbers<[1], [0], [0], [1], [0, 0, 1, 1], [], []>} : vector<256x128xbf16>, vector<128x128xbf16>, vector<256x128xf32> -> vector<256x128xf32>
    %c0_9 = arith.constant 0 : index
    %c0_10 = arith.constant 0 : index
    %12 = vector.load %arg5[%c0_9, %c0_10] : memref<1x128xf32, #tpu.memory_space<vmem>>, vector<1x128xf32>
    %13 = vector.broadcast %12 : vector<1x128xf32> to vector<256x128xf32>
    %14 = arith.addf %11, %13 : vector<256x128xf32>
    %cst_11 = arith.constant 0.000000e+00 : f32
    %15 = vector.broadcast %cst_11 : f32 to vector<256x128xf32>
    %16 = arith.maximumf %14, %15 : vector<256x128xf32>
    %c0_12 = arith.constant 0 : index
    %c0_13 = arith.constant 0 : index
    %17 = vector.load %arg11[%c0_12, %c0_13] : memref<256x128xf32, #tpu.memory_space<vmem>>, vector<256x128xf32>
    tpu.vector_store %arg11[%c0_12, %c0_13], %16 {strides = array<i32>} : memref<256x128xf32, #tpu.memory_space<vmem>>, vector<256x128xf32>,
    %18 = arith.truncf %16 : vector<256x128xf32> to vector<256x128xbf16>
    %c0_14 = arith.constant 0 : index
    %c0_15 = arith.constant 0 : index
    %19 = vector.load %arg6[%c0_14, %c0_15] : memref<128x128xbf16, #tpu.memory_space<vmem>>, vector<128x128xbf16>
    %cst_16 = arith.constant dense<0.000000e+00> : vector<256x128xf32>
    %20 = tpu.matmul %18, %19, %cst_16 {dimension_numbers = #tpu.dot_dimension_numbers<[1], [0], [0], [1], [0, 0, 1, 1], [], []>} : vector<256x128xbf16>, vector<128x128xbf16>, vector<256x128xf32> -> vector<256x128xf32>
    %c0_17 = arith.constant 0 : index
    %c0_18 = arith.constant 0 : index
    %21 = vector.load %arg7[%c0_17, %c0_18] : memref<1x128xf32, #tpu.memory_space<vmem>>, vector<1x128xf32>
    %22 = vector.broadcast %21 : vector<1x128xf32> to vector<256x128xf32>
    %23 = arith.addf %20, %22 : vector<256x128xf32>
    %cst_19 = arith.constant 0.000000e+00 : f32
    %24 = vector.broadcast %cst_19 : f32 to vector<256x128xf32>
    %25 = arith.maximumf %23, %24 : vector<256x128xf32>
    %26 = arith.truncf %25 : vector<256x128xf32> to vector<256x128xbf16>
    %c0_20 = arith.constant 0 : index
    %c0_21 = arith.constant 0 : index
    %27 = vector.load %arg8[%c0_20, %c0_21] : memref<128x128xbf16, #tpu.memory_space<vmem>>, vector<128x128xbf16>
    %cst_22 = arith.constant dense<0.000000e+00> : vector<256x128xf32>
    %28 = tpu.matmul %26, %27, %cst_22 {dimension_numbers = #tpu.dot_dimension_numbers<[1], [0], [0], [1], [0, 0, 1, 1], [], []>} : vector<256x128xbf16>, vector<128x128xbf16>, vector<256x128xf32> -> vector<256x128xf32>
    %c0_23 = arith.constant 0 : index
    %c0_24 = arith.constant 0 : index
    %29 = vector.load %arg9[%c0_23, %c0_24] : memref<1x128xf32, #tpu.memory_space<vmem>>, vector<1x128xf32>
    %30 = vector.broadcast %29 : vector<1x128xf32> to vector<256x128xf32>
    %31 = arith.addf %28, %30 : vector<256x128xf32>
    %c0_25 = arith.constant 0 : index
    %c0_26 = arith.constant 0 : index
    %32 = vector.load %arg10[%c0_25, %c0_26] : memref<256x128xf32, #tpu.memory_space<vmem>>, vector<256x128xf32>
    tpu.vector_store %arg10[%c0_25, %c0_26], %31 {strides = array<i32>} : memref<256x128xf32, #tpu.memory_space<vmem>>, vector<256x128xf32>,
    return
  }
  func.func @transform_0(%arg0: i32) -> (i32, i32) {
    %c0_i32 = arith.constant 0 : i32
    %c0_i32_0 = arith.constant 0 : i32
    return %arg0, %c0_i32 : i32, i32
  }
  func.func @transform_1(%arg0: i32) -> (i32, i32) {
    %c0_i32 = arith.constant 0 : i32
    %c0_i32_0 = arith.constant 0 : i32
    %c0_i32_1 = arith.constant 0 : i32
    return %c0_i32, %c0_i32_0 : i32, i32
  }
  func.func @transform_2(%arg0: i32) -> (i32, i32) {
    %c0_i32 = arith.constant 0 : i32
    %c0_i32_0 = arith.constant 0 : i32
    %c0_i32_1 = arith.constant 0 : i32
    return %c0_i32, %c0_i32_0 : i32, i32
  }
  func.func @transform_3(%arg0: i32) -> (i32, i32) {
    %c0_i32 = arith.constant 0 : i32
    %c0_i32_0 = arith.constant 0 : i32
    %c0_i32_1 = arith.constant 0 : i32
    return %c0_i32, %c0_i32_0 : i32, i32
  }
  func.func @transform_4(%arg0: i32) -> (i32, i32) {
    %c0_i32 = arith.constant 0 : i32
    %c0_i32_0 = arith.constant 0 : i32
    %c0_i32_1 = arith.constant 0 : i32
    return %c0_i32, %c0_i32_0 : i32, i32
  }
  func.func @transform_5(%arg0: i32) -> (i32, i32) {
    %c0_i32 = arith.constant 0 : i32
    %c0_i32_0 = arith.constant 0 : i32
    %c0_i32_1 = arith.constant 0 : i32
    return %c0_i32, %c0_i32_0 : i32, i32
  }
  func.func @transform_6(%arg0: i32) -> (i32, i32) {
    %c0_i32 = arith.constant 0 : i32
    %c0_i32_0 = arith.constant 0 : i32
    %c0_i32_1 = arith.constant 0 : i32
    return %c0_i32, %c0_i32_0 : i32, i32
  }
  func.func @transform_7(%arg0: i32) -> (i32, i32) {
    %c0_i32 = arith.constant 0 : i32
    %c0_i32_0 = arith.constant 0 : i32
    %c0_i32_1 = arith.constant 0 : i32
    return %c0_i32, %c0_i32_0 : i32, i32
  }
  func.func @transform_8(%arg0: i32) -> (i32, i32) {
    %c0_i32 = arith.constant 0 : i32
    %c0_i32_0 = arith.constant 0 : i32
    %c0_i32_1 = arith.constant 0 : i32
    return %c0_i32, %c0_i32_0 : i32, i32
  }
  func.func @transform_9(%arg0: i32) -> (i32, i32) {
    %c0_i32 = arith.constant 0 : i32
    %c0_i32_0 = arith.constant 0 : i32
    return %arg0, %c0_i32 : i32, i32
  }
  func.func @transform_10(%arg0: i32) -> (i32, i32) {
    %c0_i32 = arith.constant 0 : i32
    %c0_i32_0 = arith.constant 0 : i32
    return %arg0, %c0_i32 : i32, i32
  }
}

module attributes {stable_mosaic.version = 11 : i64} {
  func.func @_ae_kernel(%arg0: i32, %arg1: memref<256x128xf32, #tpu.memory_space<vmem>>, %arg2: memref<128x128xbf16, #tpu.memory_space<vmem>>, %arg3: memref<1x128xf32, #tpu.memory_space<vmem>>, %arg4: memref<128x128xbf16, #tpu.memory_space<vmem>>, %arg5: memref<1x128xf32, #tpu.memory_space<vmem>>, %arg6: memref<128x128xbf16, #tpu.memory_space<vmem>>, %arg7: memref<1x128xf32, #tpu.memory_space<vmem>>, %arg8: memref<128x128xbf16, #tpu.memory_space<vmem>>, %arg9: memref<1x128xf32, #tpu.memory_space<vmem>>, %arg10: memref<256x128xf32, #tpu.memory_space<vmem>>, %arg11: memref<256x128xf32, #tpu.memory_space<vmem>>) attributes {dimension_semantics = [#tpu.dimension_semantics<parallel>], iteration_bounds = array<i64: 1>, scalar_prefetch = 0 : i64, scratch_operands = 0 : i64, tpu.core_type = #tpu.core_type<tc>, window_params = [{transform_indices = @transform_0, window_bounds = array<i64: 256, 128>}, {pipeline_mode = #tpu.pipeline_mode<synchronous>, transform_indices = @transform_1, window_bounds = array<i64: 128, 128>}, {pipeline_mode = #tpu.pipeline_mode<synchronous>, transform_indices = @transform_2, window_bounds = array<i64: 1, 128>}, {pipeline_mode = #tpu.pipeline_mode<synchronous>, transform_indices = @transform_3, window_bounds = array<i64: 128, 128>}, {pipeline_mode = #tpu.pipeline_mode<synchronous>, transform_indices = @transform_4, window_bounds = array<i64: 1, 128>}, {pipeline_mode = #tpu.pipeline_mode<synchronous>, transform_indices = @transform_5, window_bounds = array<i64: 128, 128>}, {pipeline_mode = #tpu.pipeline_mode<synchronous>, transform_indices = @transform_6, window_bounds = array<i64: 1, 128>}, {pipeline_mode = #tpu.pipeline_mode<synchronous>, transform_indices = @transform_7, window_bounds = array<i64: 128, 128>}, {pipeline_mode = #tpu.pipeline_mode<synchronous>, transform_indices = @transform_8, window_bounds = array<i64: 1, 128>}, {transform_indices = @transform_9, window_bounds = array<i64: 256, 128>}, {transform_indices = @transform_10, window_bounds = array<i64: 256, 128>}]} {
    %c0 = arith.constant 0 : index
    %c0_0 = arith.constant 0 : index
    %0 = vector.load %arg1[%c0, %c0_0] : memref<256x128xf32, #tpu.memory_space<vmem>>, vector<256x128xf32>
    %1 = arith.truncf %0 : vector<256x128xf32> to vector<256x128xbf16>
    %c0_1 = arith.constant 0 : index
    %c0_2 = arith.constant 0 : index
    %2 = vector.load %arg2[%c0_1, %c0_2] : memref<128x128xbf16, #tpu.memory_space<vmem>>, vector<128x128xbf16>
    %cst = arith.constant dense<0.000000e+00> : vector<256x128xf32>
    %3 = tpu.matmul %1, %2, %cst {dimension_numbers = #tpu.dot_dimension_numbers<[1], [0], [0], [1], [0, 0, 1, 1], [], []>} : vector<256x128xbf16>, vector<128x128xbf16>, vector<256x128xf32> -> vector<256x128xf32>
    %c0_3 = arith.constant 0 : index
    %c0_4 = arith.constant 0 : index
    %4 = vector.load %arg3[%c0_3, %c0_4] : memref<1x128xf32, #tpu.memory_space<vmem>>, vector<1x128xf32>
    %5 = vector.broadcast %4 : vector<1x128xf32> to vector<256x128xf32>
    %6 = arith.addf %3, %5 : vector<256x128xf32>
    %cst_5 = arith.constant 0.000000e+00 : f32
    %7 = vector.broadcast %cst_5 : f32 to vector<256x128xf32>
    %8 = arith.maximumf %6, %7 : vector<256x128xf32>
    %9 = arith.truncf %8 : vector<256x128xf32> to vector<256x128xbf16>
    %c0_6 = arith.constant 0 : index
    %c0_7 = arith.constant 0 : index
    %10 = vector.load %arg4[%c0_6, %c0_7] : memref<128x128xbf16, #tpu.memory_space<vmem>>, vector<128x128xbf16>
    %cst_8 = arith.constant dense<0.000000e+00> : vector<256x128xf32>
    %11 = tpu.matmul %9, %10, %cst_8 {dimension_numbers = #tpu.dot_dimension_numbers<[1], [0], [0], [1], [0, 0, 1, 1], [], []>} : vector<256x128xbf16>, vector<128x128xbf16>, vector<256x128xf32> -> vector<256x128xf32>
    %c0_9 = arith.constant 0 : index
    %c0_10 = arith.constant 0 : index
    %12 = vector.load %arg5[%c0_9, %c0_10] : memref<1x128xf32, #tpu.memory_space<vmem>>, vector<1x128xf32>
    %13 = vector.broadcast %12 : vector<1x128xf32> to vector<256x128xf32>
    %14 = arith.addf %11, %13 : vector<256x128xf32>
    %cst_11 = arith.constant 0.000000e+00 : f32
    %15 = vector.broadcast %cst_11 : f32 to vector<256x128xf32>
    %16 = arith.maximumf %14, %15 : vector<256x128xf32>
    %c0_12 = arith.constant 0 : index
    %c0_13 = arith.constant 0 : index
    %17 = vector.load %arg11[%c0_12, %c0_13] : memref<256x128xf32, #tpu.memory_space<vmem>>, vector<256x128xf32>
    tpu.vector_store %arg11[%c0_12, %c0_13], %16 {strides = array<i32>} : memref<256x128xf32, #tpu.memory_space<vmem>>, vector<256x128xf32>,
    %18 = arith.truncf %16 : vector<256x128xf32> to vector<256x128xbf16>
    %c0_14 = arith.constant 0 : index
    %c0_15 = arith.constant 0 : index
    %19 = vector.load %arg6[%c0_14, %c0_15] : memref<128x128xbf16, #tpu.memory_space<vmem>>, vector<128x128xbf16>
    %cst_16 = arith.constant dense<0.000000e+00> : vector<256x128xf32>
    %20 = tpu.matmul %18, %19, %cst_16 {dimension_numbers = #tpu.dot_dimension_numbers<[1], [0], [0], [1], [0, 0, 1, 1], [], []>} : vector<256x128xbf16>, vector<128x128xbf16>, vector<256x128xf32> -> vector<256x128xf32>
    %c0_17 = arith.constant 0 : index
    %c0_18 = arith.constant 0 : index
    %21 = vector.load %arg7[%c0_17, %c0_18] : memref<1x128xf32, #tpu.memory_space<vmem>>, vector<1x128xf32>
    %22 = vector.broadcast %21 : vector<1x128xf32> to vector<256x128xf32>
    %23 = arith.addf %20, %22 : vector<256x128xf32>
    %cst_19 = arith.constant 0.000000e+00 : f32
    %24 = vector.broadcast %cst_19 : f32 to vector<256x128xf32>
    %25 = arith.maximumf %23, %24 : vector<256x128xf32>
    %26 = arith.truncf %25 : vector<256x128xf32> to vector<256x128xbf16>
    %c0_20 = arith.constant 0 : index
    %c0_21 = arith.constant 0 : index
    %27 = vector.load %arg8[%c0_20, %c0_21] : memref<128x128xbf16, #tpu.memory_space<vmem>>, vector<128x128xbf16>
    %cst_22 = arith.constant dense<0.000000e+00> : vector<256x128xf32>
    %28 = tpu.matmul %26, %27, %cst_22 {dimension_numbers = #tpu.dot_dimension_numbers<[1], [0], [0], [1], [0, 0, 1, 1], [], []>} : vector<256x128xbf16>, vector<128x128xbf16>, vector<256x128xf32> -> vector<256x128xf32>
    %c0_23 = arith.constant 0 : index
    %c0_24 = arith.constant 0 : index
    %29 = vector.load %arg9[%c0_23, %c0_24] : memref<1x128xf32, #tpu.memory_space<vmem>>, vector<1x128xf32>
    %30 = vector.broadcast %29 : vector<1x128xf32> to vector<256x128xf32>
    %31 = arith.addf %28, %30 : vector<256x128xf32>
    %c0_25 = arith.constant 0 : index
    %c0_26 = arith.constant 0 : index
    %32 = vector.load %arg10[%c0_25, %c0_26] : memref<256x128xf32, #tpu.memory_space<vmem>>, vector<256x128xf32>
    tpu.vector_store %arg10[%c0_25, %c0_26], %31 {strides = array<i32>} : memref<256x128xf32, #tpu.memory_space<vmem>>, vector<256x128xf32>,
    return
  }
  func.func @transform_0(%arg0: i32) -> (i32, i32) {
    %c0_i32 = arith.constant 0 : i32
    %c0_i32_0 = arith.constant 0 : i32
    return %arg0, %c0_i32 : i32, i32
  }
  func.func @transform_1(%arg0: i32) -> (i32, i32) {
    %c0_i32 = arith.constant 0 : i32
    %c0_i32_0 = arith.constant 0 : i32
    %c0_i32_1 = arith.constant 0 : i32
    return %c0_i32, %c0_i32_0 : i32, i32
  }
  func.func @transform_2(%arg0: i32) -> (i32, i32) {
    %c0_i32 = arith.constant 0 : i32
    %c0_i32_0 = arith.constant 0 : i32
    %c0_i32_1 = arith.constant 0 : i32
    return %c0_i32, %c0_i32_0 : i32, i32
  }
  func.func @transform_3(%arg0: i32) -> (i32, i32) {
    %c0_i32 = arith.constant 0 : i32
    %c0_i32_0 = arith.constant 0 : i32
    %c0_i32_1 = arith.constant 0 : i32
    return %c0_i32, %c0_i32_0 : i32, i32
  }
  func.func @transform_4(%arg0: i32) -> (i32, i32) {
    %c0_i32 = arith.constant 0 : i32
    %c0_i32_0 = arith.constant 0 : i32
    %c0_i32_1 = arith.constant 0 : i32
    return %c0_i32, %c0_i32_0 : i32, i32
  }
  func.func @transform_5(%arg0: i32) -> (i32, i32) {
    %c0_i32 = arith.constant 0 : i32
    %c0_i32_0 = arith.constant 0 : i32
    %c0_i32_1 = arith.constant 0 : i32
    return %c0_i32, %c0_i32_0 : i32, i32
  }
  func.func @transform_6(%arg0: i32) -> (i32, i32) {
    %c0_i32 = arith.constant 0 : i32
    %c0_i32_0 = arith.constant 0 : i32
    %c0_i32_1 = arith.constant 0 : i32
    return %c0_i32, %c0_i32_0 : i32, i32
  }
  func.func @transform_7(%arg0: i32) -> (i32, i32) {
    %c0_i32 = arith.constant 0 : i32
    %c0_i32_0 = arith.constant 0 : i32
    %c0_i32_1 = arith.constant 0 : i32
    return %c0_i32, %c0_i32_0 : i32, i32
  }
  func.func @transform_8(%arg0: i32) -> (i32, i32) {
    %c0_i32 = arith.constant 0 : i32
    %c0_i32_0 = arith.constant 0 : i32
    %c0_i32_1 = arith.constant 0 : i32
    return %c0_i32, %c0_i32_0 : i32, i32
  }
  func.func @transform_9(%arg0: i32) -> (i32, i32) {
    %c0_i32 = arith.constant 0 : i32
    %c0_i32_0 = arith.constant 0 : i32
    return %arg0, %c0_i32 : i32, i32
  }
  func.func @transform_10(%arg0: i32) -> (i32, i32) {
    %c0_i32 = arith.constant 0 : i32
    %c0_i32_0 = arith.constant 0 : i32
    return %arg0, %c0_i32 : i32, i32
  }
}

</mosaic_0001>

<bundles_post_ra>
// kernel: _forward_impl.1
= control target key start
LH: loop header
LB: loop body
LE: loop exit
PB: predicated region body
PF: predicated region fallthrough
CT: control target
= control target key end

     0   :  { %s2170_s1 = inlined_call_operand.vmem [shape: bf16[128,128], index: 1, kind: input, shape index: {}]   ;;  %s2171_s0 = inlined_call_operand.vmem [shape: f32[256,128], index: 0, kind: input, shape index: {}]   ;;  %s2172_s3 = inlined_call_operand.vmem [shape: bf16[128,128], index: 3, kind: input, shape index: {}]   ;;  %s2173_s5 = inlined_call_operand.vmem [shape: bf16[128,128], index: 5, kind: input, shape index: {}]   ;;  %s2174_s2 = inlined_call_operand.vmem [shape: f32[1,128], index: 2, kind: input, shape index: {}]   ;;  %s2175_s7 = inlined_call_operand.vmem [shape: bf16[128,128], index: 7, kind: input, shape index: {}]   ;;  %s2176_s4 = inlined_call_operand.vmem [shape: f32[1,128], index: 4, kind: input, shape index: {}]   ;;  %s2177_s10 = inlined_call_operand.vmem [shape: f32[256,128], index: 10, kind: output, shape index: {1}]   ;;  %s2178_s6 = inlined_call_operand.vmem [shape: f32[1,128], index: 6, kind: input, shape index: {}]   ;;  %s2179_s8 = inlined_call_operand.vmem [shape: f32[1,128], index: 8, kind: input, shape index: {}]   ;;  %s2180_s9 = inlined_call_operand.vmem [shape: f32[256,128], index: 9, kind: output, shape index: {0}]  }
   0x1   :  { %v1551_v0 = vld [vmem:[%s2170_s1] sm:$0xff]   ;;  %v1552_v1 = vld [vmem:[%s2170_s1 + $0x8] sm:$0xff]   ;;  %v1553_v2 = vld [vmem:[%s2170_s1 + $0x10] sm:$0xff]  }
   0x2   :  { %1359 = vmatprep.subr.bf16.mxu0 %v1551_v0  ;;  %v1554_v3 = vld [vmem:[%s2170_s1 + $0x18] sm:$0xff]   ;;  %v35_v4 = vld [vmem:[%s2171_s0] sm:$0xff]  ;;  %v36_v5 = vld [vmem:[%s2171_s0 + $0x8] sm:$0xff] }
   0x3   :  { %1360 = vmatpush3.bf16.msra.mxu0 %v1551_v0  ;;  %v67_v6 = vpack.c.bf16 %v36_v5, %v35_v4  ;;  %v1555_v7 = vld [vmem:[%s2170_s1 + $0x20] sm:$0xff]   ;;  %v1556_v8 = vld [vmem:[%s2170_s1 + $0x28] sm:$0xff]   ;;  %v1557_v9 = vld [vmem:[%s2170_s1 + $0x30] sm:$0xff]  }
   0x4   :  { %1361 = vmatprep.subr.bf16.mxu0 %v1552_v1  ;;  %v1559_v10 = vld [vmem:[%s2172_s3] sm:$0xff]   ;;  %v1560_v11 = vld [vmem:[%s2172_s3 + $0x8] sm:$0xff]   ;;  %v1561_v12 = vld [vmem:[%s2172_s3 + $0x10] sm:$0xff]  }
   0x5   :  { %1375 = vmatprep.mubr.bf16.mxu0 %v67_v6  ;;  %1407 = vmatprep.subr.bf16.mxu1 %v1559_v10  ;;  %v1558_v13 = vld [vmem:[%s2170_s1 + $0x38] sm:$0xff]   ;;  %v37_v14 = vld [vmem:[%s2171_s0 + $0x10] sm:$0xff]  ;;  %v39_v17 = vld [vmem:[%s2171_s0 + $0x20] sm:$0xff] }
   0x6   :  { %1408 = vmatpush3.bf16.msra.mxu1 %v1559_v10  ;;  %v38_v15 = vld [vmem:[%s2171_s0 + $0x18] sm:$0xff]  ;;  %v40_v18 = vld [vmem:[%s2171_s0 + $0x28] sm:$0xff]  ;;  %v1563_v21 = vld [vmem:[%s2172_s3 + $0x20] sm:$0xff]  }
   0x7   :  { %1362 = vmatpush3.bf16.msra.mxu0 %v1552_v1  ;;  %1409 = vmatprep.subr.bf16.mxu1 %v1560_v11  ;;  %v1562_v16 = vld [vmem:[%s2172_s3 + $0x18] sm:$0xff]   ;;  %v68_v19 = vpack.c.bf16 %v38_v15, %v37_v14  ;;  %v69_v20 = vpack.c.bf16 %v40_v18, %v39_v17  ;;  %v41_v22 = vld [vmem:[%s2171_s0 + $0x30] sm:$0xff]  ;;  %v1564_v24 = vld [vmem:[%s2172_s3 + $0x28] sm:$0xff]  }
   0x8   :  { %1363 = vmatprep.subr.bf16.mxu0 %v1553_v2  ;;  %v42_v23 = vld [vmem:[%s2171_s0 + $0x38] sm:$0xff]  ;;  %v43_v25 = vld [vmem:[%s2171_s0 + $0x40] sm:$0xff]  ;;  %v44_v26 = vld [vmem:[%s2171_s0 + $0x48] sm:$0xff] }
   0x9   :  { %v70_v27 = vpack.c.bf16 %v42_v23, %v41_v22  ;;  %v71_v28 = vpack.c.bf16 %v44_v26, %v43_v25  ;;  %v45_v29 = vld [vmem:[%s2171_s0 + $0x50] sm:$0xff]  ;;  %v46_v30 = vld [vmem:[%s2171_s0 + $0x58] sm:$0xff]  ;;  %v47_v31 = vld [vmem:[%s2171_s0 + $0x60] sm:$0xff] }
   0xa   :  { %1410 = vmatpush3.bf16.msra.mxu1 %v1560_v11  ;;  %v48_v32 = vld [vmem:[%s2171_s0 + $0x68] sm:$0xff]  ;;  %v72_v33 = vpack.c.bf16 %v46_v30, %v45_v29  ;;  %v49_v35 = vld [vmem:[%s2171_s0 + $0x70] sm:$0xff]  ;;  %v50_v36 = vld [vmem:[%s2171_s0 + $0x78] sm:$0xff] }
   0xb   :  { %1364 = vmatpush3.bf16.msra.mxu0 %v1553_v2  ;;  %1411 = vmatprep.subr.bf16.mxu1 %v1561_v12  ;;  %v73_v34 = vpack.c.bf16 %v48_v32, %v47_v31  ;;  %v51_v37 = vld [vmem:[%s2171_s0 + $0x80] sm:$0xff]  ;;  %v52_v38 = vld [vmem:[%s2171_s0 + $0x88] sm:$0xff]  ;;  %v74_v39 = vpack.c.bf16 %v50_v36, %v49_v35  ;;  %v53_v41 = vld [vmem:[%s2171_s0 + $0x90] sm:$0xff] }
   0xc   :  { %1365 = vmatprep.subr.bf16.mxu0 %v1554_v3  ;;  %v75_v40 = vpack.c.bf16 %v52_v38, %v51_v37  ;;  %v54_v42 = vld [vmem:[%s2171_s0 + $0x98] sm:$0xff]  ;;  %v55_v43 = vld [vmem:[%s2171_s0 + $0xa0] sm:$0xff]  ;;  %v56_v44 = vld [vmem:[%s2171_s0 + $0xa8] sm:$0xff] }
   0xd   :  { %v76_v45 = vpack.c.bf16 %v54_v42, %v53_v41  ;;  %v77_v46 = vpack.c.bf16 %v56_v44, %v55_v43  ;;  %v57_v47 = vld [vmem:[%s2171_s0 + $0xb0] sm:$0xff]  ;;  %v58_v48 = vld [vmem:[%s2171_s0 + $0xb8] sm:$0xff]  ;;  %v59_v49 = vld [vmem:[%s2171_s0 + $0xc0] sm:$0xff] }
   0xe   :  { %1412 = vmatpush3.bf16.msra.mxu1 %v1561_v12  ;;  %v60_v50 = vld [vmem:[%s2171_s0 + $0xc8] sm:$0xff]  ;;  %v78_v51 = vpack.c.bf16 %v58_v48, %v57_v47  ;;  %v61_v53 = vld [vmem:[%s2171_s0 + $0xd0] sm:$0xff]  ;;  %v62_v54 = vld [vmem:[%s2171_s0 + $0xd8] sm:$0xff] }
   0xf   :  { %1366 = vmatpush3.bf16.msra.mxu0 %v1554_v3  ;;  %1413 = vmatprep.subr.bf16.mxu1 %v1562_v16  ;;  %v79_v52 = vpack.c.bf16 %v60_v50, %v59_v49  ;;  %v63_v55 = vld [vmem:[%s2171_s0 + $0xe0] sm:$0xff]  ;;  %v64_v56 = vld [vmem:[%s2171_s0 + $0xe8] sm:$0xff]  ;;  %v80_v57 = vpack.c.bf16 %v62_v54, %v61_v53  ;;  %v65_v59 = vld [vmem:[%s2171_s0 + $0xf0] sm:$0xff] }
  0x10   :  { %1367 = vmatprep.subr.bf16.mxu0 %v1555_v7  ;;  %v81_v58 = vpack.c.bf16 %v64_v56, %v63_v55  ;;  %v66_v60 = vld [vmem:[%s2171_s0 + $0xf8] sm:$0xff]  ;;  %v1565_v62 = vld [vmem:[%s2172_s3 + $0x30] sm:$0xff]   ;;  %v1567_v0 = vld [vmem:[%s2173_s5] sm:$0xff]  }
  0x11   :  { %v82_v61 = vpack.c.bf16 %v66_v60, %v65_v59  ;;  %v1566_v63 = vld [vmem:[%s2172_s3 + $0x38] sm:$0xff]   ;;  %v1568_v1 = vld [vmem:[%s2173_s5 + $0x8] sm:$0xff]   ;;  %v1569_v2 = vld [vmem:[%s2173_s5 + $0x10] sm:$0xff]  }
  0x12   :  { %1414 = vmatpush3.bf16.msra.mxu1 %v1562_v16  ;;  %v1570_v3 = vld [vmem:[%s2173_s5 + $0x18] sm:$0xff]   ;;  %v1571_v4 = vld [vmem:[%s2173_s5 + $0x20] sm:$0xff]   ;;  %v1572_v5 = vld [vmem:[%s2173_s5 + $0x28] sm:$0xff]  }
  0x13   :  { %1368 = vmatpush3.bf16.msra.mxu0 %v1555_v7  ;;  %1415 = vmatprep.subr.bf16.mxu1 %v1563_v21  ;;  %v1573_v6 = vld [vmem:[%s2173_s5 + $0x30] sm:$0xff]   ;;  %v1806_v7 = vld [vmem:[%s2174_s2] ss:$0 sm:$0xff] }
  0x14   :  { %1369 = vmatprep.subr.bf16.mxu0 %v1556_v8 }
  0x16   :  { %1416 = vmatpush3.bf16.msra.mxu1 %v1563_v21 }
  0x17   :  { %1370 = vmatpush3.bf16.msra.mxu0 %v1556_v8  ;;  %1417 = vmatprep.subr.bf16.mxu1 %v1564_v24 }
  0x18   :  { %1371 = vmatprep.subr.bf16.mxu0 %v1557_v9 }
  0x1a   :  { %1418 = vmatpush3.bf16.msra.mxu1 %v1564_v24 }
  0x1b   :  { %1372 = vmatpush3.bf16.msra.mxu0 %v1557_v9  ;;  %1419 = vmatprep.subr.bf16.mxu1 %v1565_v62 }
  0x1c   :  { %1373 = vmatprep.subr.bf16.mxu0 %v1558_v13 }
  0x1e   :  { %1420 = vmatpush3.bf16.msra.mxu1 %v1565_v62 }
  0x1f   :  { %1374 = vmatpush3.bf16.msra.mxu0 %v1558_v13  ;;  %1421 = vmatprep.subr.bf16.mxu1 %v1566_v63 }
  0x20   :  { %1455 = vmatprep.subr.bf16.mxu0 %v1567_v0 }
  0x22   :  { %1376 = vmatmul.mubr.bf16.vlgmr.msra.gmra.mrb[0].mxu0 %v68_v19  ;;  %1422 = vmatpush3.bf16.msra.mxu1 %v1566_v63 }
  0x23   :  { %1379 = vmatprep.mubr.bf16.mxu0 %v69_v20  ;;  %1456 = vmatpush3.bf16.msra.mxu0 %v1567_v0 }
  0x24   :  { %1457 = vmatprep.subr.bf16.mxu0 %v1568_v1 }
  0x27   :  { %1458 = vmatpush3.bf16.msra.mxu0 %v1568_v1 }
  0x28   :  { %1459 = vmatprep.subr.bf16.mxu0 %v1569_v2 }
  0x2a   :  { %1380 = vmatmul.mubr.bf16.gmra.mrb[4].mxu0 %v70_v27 }
  0x2b   :  { %1383 = vmatprep.mubr.bf16.mxu0 %v71_v28  ;;  %1460 = vmatpush3.bf16.msra.mxu0 %v1569_v2 }
  0x2c   :  { %1461 = vmatprep.subr.bf16.mxu0 %v1570_v3 }
  0x2f   :  { %1462 = vmatpush3.bf16.msra.mxu0 %v1570_v3 }
  0x30   :  { %1463 = vmatprep.subr.bf16.mxu0 %v1571_v4 }
  0x32   :  { %1384 = vmatmul.mubr.bf16.gmra.mrb[8].mxu0 %v72_v33 }
  0x33   :  { %1387 = vmatprep.mubr.bf16.mxu0 %v73_v34  ;;  %1464 = vmatpush3.bf16.msra.mxu0 %v1571_v4 }
  0x34   :  { %1465 = vmatprep.subr.bf16.mxu0 %v1572_v5 }
  0x37   :  { %1466 = vmatpush3.bf16.msra.mxu0 %v1572_v5 }
  0x38   :  { %1467 = vmatprep.subr.bf16.mxu0 %v1573_v6 }
  0x3a   :  { %1388 = vmatmul.mubr.bf16.gmra.mrb[12].mxu0 %v74_v39 }
  0x3b   :  { %1391 = vmatprep.mubr.bf16.mxu0 %v75_v40  ;;  %1468 = vmatpush3.bf16.msra.mxu0 %v1573_v6 }
  0x42   :  { %1392 = vmatmul.mubr.bf16.gmra.mrb[16].mxu0 %v76_v45 }
  0x43   :  { %1395 = vmatprep.mubr.bf16.mxu0 %v77_v46 }
  0x4a   :  { %1396 = vmatmul.mubr.bf16.gmra.mrb[20].mxu0 %v78_v51 }
  0x4b   :  { %1399 = vmatprep.mubr.bf16.mxu0 %v79_v52 }
  0x52   :  { %1400 = vmatmul.mubr.bf16.gmra.mrb[24].mxu0 %v80_v57 }
  0x53   :  { %1403 = vmatprep.mubr.bf16.mxu0 %v81_v58 }
  0x5a   :  { %1404 = vmatmul.mubr.bf16.gmra.mrb[28].mxu0 %v82_v61 }
  0xf5   :  { %v1377_v8 = vpop.f32.mrb[0].mxu0 }
  0xf6   :  { %v197_v9 = vadd.f32 %v1377_v8, %v1806_v7  ;;  %v188_v10 = vpop.f32.mrb[1].mxu0 }
  0xf7   :  { %v189_v11 = vadd.f32 %v1806_v7, %v188_v10  ;;  %v1378_v12 = vpop.f32.mrb[2].mxu0 }
  0xf8   :  { %v200_v13 = vadd.f32 %v1378_v12, %v1806_v7  ;;  %v191_v14 = vpop.f32.mrb[3].mxu0  ;;  %v317_v16 = vmax.f32 %v197_v9, 0.0 }
  0xf9   :  { %v192_v15 = vadd.f32 %v1806_v7, %v191_v14  ;;  %v315_v18 = vmax.f32 %v189_v11, 0.0 }
  0xfa   :  { %v318_v17 = vmax.f32 %v200_v13, 0.0 }
  0xfb   :  { %v316_v19 = vmax.f32 %v192_v15, 0.0 }
  0xfc   :  { %v348_v20 = vpack.c.bf16 %v318_v17, %v317_v16 }
  0xfd   :  { %v1381_v21 = vpop.f32.mrb[4].mxu0  ;;  %v347_v22 = vpack.c.bf16 %v316_v19, %v315_v18 }
  0xfe   :  { %v213_v23 = vadd.f32 %v1381_v21, %v1806_v7  ;;  %v204_v24 = vpop.f32.mrb[5].mxu0 }
  0xff   :  { %v205_v25 = vadd.f32 %v1806_v7, %v204_v24  ;;  %v1382_v26 = vpop.f32.mrb[6].mxu0  ;;  %1423 = vmatprep.mubr.bf16.mxu1 %v347_v22 }
 0x100   :  { %v216_v27 = vadd.f32 %v1382_v26, %v1806_v7  ;;  %v207_v28 = vpop.f32.mrb[7].mxu0  ;;  %1424 = vmatmul.mubr.bf16.vlgmr.msra.gmra.mrb[0].mxu1 %v348_v20  ;;  %v321_v30 = vmax.f32 %v213_v23, 0.0 }
 0x101   :  { %v208_v29 = vadd.f32 %v1806_v7, %v207_v28  ;;  %v319_v32 = vmax.f32 %v205_v25, 0.0 }
 0x102   :  { %v322_v31 = vmax.f32 %v216_v27, 0.0 }
 0x103   :  { %v320_v33 = vmax.f32 %v208_v29, 0.0 }
 0x104   :  { %v350_v34 = vpack.c.bf16 %v322_v31, %v321_v30 }
 0x105   :  { %v349_v35 = vpack.c.bf16 %v320_v33, %v319_v32  ;;  %v1385_v36 = vpop.f32.mrb[8].mxu0 }
 0x106   :  { %v229_v37 = vadd.f32 %v1385_v36, %v1806_v7  ;;  %v220_v38 = vpop.f32.mrb[9].mxu0 }
 0x107   :  { %v221_v39 = vadd.f32 %v1806_v7, %v220_v38  ;;  %v1386_v40 = vpop.f32.mrb[10].mxu0  ;;  %1427 = vmatprep.mubr.bf16.mxu1 %v349_v35 }
 0x108   :  { %v232_v41 = vadd.f32 %v1386_v40, %v1806_v7  ;;  %v223_v42 = vpop.f32.mrb[11].mxu0  ;;  %1428 = vmatmul.mubr.bf16.gmra.mrb[4].mxu1 %v350_v34  ;;  %v325_v44 = vmax.f32 %v229_v37, 0.0 }
 0x109   :  { %v224_v43 = vadd.f32 %v1806_v7, %v223_v42  ;;  %v323_v46 = vmax.f32 %v221_v39, 0.0 }
 0x10a   :  { %v326_v45 = vmax.f32 %v232_v41, 0.0 }
 0x10b   :  { %v324_v47 = vmax.f32 %v224_v43, 0.0 }
 0x10c   :  { %v352_v48 = vpack.c.bf16 %v326_v45, %v325_v44 }
 0x10d   :  { %v351_v49 = vpack.c.bf16 %v324_v47, %v323_v46  ;;  %v1389_v50 = vpop.f32.mrb[12].mxu0 }
 0x10e   :  { %v245_v51 = vadd.f32 %v1389_v50, %v1806_v7  ;;  %v236_v52 = vpop.f32.mrb[13].mxu0 }
 0x10f   :  { %v237_v53 = vadd.f32 %v1806_v7, %v236_v52  ;;  %v1390_v54 = vpop.f32.mrb[14].mxu0  ;;  %1431 = vmatprep.mubr.bf16.mxu1 %v351_v49 }
 0x110   :  { %v248_v55 = vadd.f32 %v1390_v54, %v1806_v7  ;;  %v239_v56 = vpop.f32.mrb[15].mxu0  ;;  %1432 = vmatmul.mubr.bf16.gmra.mrb[8].mxu1 %v352_v48  ;;  %v329_v58 = vmax.f32 %v245_v51, 0.0 }
 0x111   :  { %v240_v57 = vadd.f32 %v1806_v7, %v239_v56  ;;  %v327_v60 = vmax.f32 %v237_v53, 0.0 }
 0x112   :  { %v330_v59 = vmax.f32 %v248_v55, 0.0 }
 0x113   :  { %v328_v61 = vmax.f32 %v240_v57, 0.0  ;;  %v1574_v57 = vld [vmem:[%s2173_s5 + $0x38] sm:$0xff]  }
 0x114   :  { %v354_v62 = vpack.c.bf16 %v330_v59, %v329_v58  ;;  %1469 = vmatprep.subr.bf16.mxu0 %v1574_v57  ;;  %v1575_v58 = vld [vmem:[%s2175_s7] sm:$0xff]   ;;  %v1577_v59 = vld [vmem:[%s2175_s7 + $0x10] sm:$0xff]  }
 0x115   :  { %v353_v63 = vpack.c.bf16 %v328_v61, %v327_v60  ;;  %v1393_v0 = vpop.f32.mrb[16].mxu0  ;;  %1470 = vmatpush3.bf16.msra.mxu0 %v1574_v57  ;;  %1503 = vmatprep.subr.bf16.mxu1 %v1575_v58  ;;  %v1578_v60 = vld [vmem:[%s2175_s7 + $0x18] sm:$0xff]   ;;  %v1579_v61 = vld [vmem:[%s2175_s7 + $0x20] sm:$0xff]  }
 0x116   :  { %v261_v1 = vadd.f32 %v1393_v0, %v1806_v7  ;;  %v252_v2 = vpop.f32.mrb[17].mxu0  ;;  %1504 = vmatpush3.bf16.msra.mxu1 %v1575_v58  ;;  %v1867_v0 = vld [vmem:[%s2176_s4] ss:$0 sm:$0xff] }
 0x117   :  { %v253_v3 = vadd.f32 %v1806_v7, %v252_v2  ;;  %v1394_v4 = vpop.f32.mrb[18].mxu0  ;;  %1435 = vmatprep.mubr.bf16.mxu1 %v353_v63  ;;  %v1581_v63 = vld [vmem:[%s2175_s7 + $0x30] sm:$0xff]  }
 0x118   :  { %v264_v5 = vadd.f32 %v1394_v4, %v1806_v7  ;;  %v255_v6 = vpop.f32.mrb[19].mxu0  ;;  %1436 = vmatmul.mubr.bf16.gmra.mrb[12].mxu1 %v354_v62  ;;  %v333_v9 = vmax.f32 %v261_v1, 0.0  ;;  %v1580_v62 = vld [vmem:[%s2175_s7 + $0x28] sm:$0xff]  }
 0x119   :  { %v256_v8 = vadd.f32 %v1806_v7, %v255_v6  ;;  %v331_v11 = vmax.f32 %v253_v3, 0.0 }
 0x11a   :  { %v334_v10 = vmax.f32 %v264_v5, 0.0 }
 0x11b   :  { %v332_v12 = vmax.f32 %v256_v8, 0.0 }
 0x11c   :  { %v356_v13 = vpack.c.bf16 %v334_v10, %v333_v9 }
 0x11d   :  { %v355_v14 = vpack.c.bf16 %v332_v12, %v331_v11  ;;  %v1397_v15 = vpop.f32.mrb[20].mxu0 }
 0x11e   :  { %v277_v16 = vadd.f32 %v1397_v15, %v1806_v7  ;;  %v268_v17 = vpop.f32.mrb[21].mxu0 }
 0x11f   :  { %v269_v18 = vadd.f32 %v1806_v7, %v268_v17  ;;  %v1398_v19 = vpop.f32.mrb[22].mxu0  ;;  %1439 = vmatprep.mubr.bf16.mxu1 %v355_v14 }
 0x120   :  { %v280_v20 = vadd.f32 %v1398_v19, %v1806_v7  ;;  %v271_v21 = vpop.f32.mrb[23].mxu0  ;;  %1440 = vmatmul.mubr.bf16.gmra.mrb[16].mxu1 %v356_v13  ;;  %v337_v23 = vmax.f32 %v277_v16, 0.0 }
 0x121   :  { %v272_v22 = vadd.f32 %v1806_v7, %v271_v21  ;;  %v335_v25 = vmax.f32 %v269_v18, 0.0 }
 0x122   :  { %v338_v24 = vmax.f32 %v280_v20, 0.0 }
 0x123   :  { %v336_v26 = vmax.f32 %v272_v22, 0.0 }
 0x124   :  { %v358_v27 = vpack.c.bf16 %v338_v24, %v337_v23 }
 0x125   :  { %v357_v28 = vpack.c.bf16 %v336_v26, %v335_v25  ;;  %v1401_v29 = vpop.f32.mrb[24].mxu0 }
 0x126   :  { %v293_v30 = vadd.f32 %v1401_v29, %v1806_v7  ;;  %v284_v31 = vpop.f32.mrb[25].mxu0 }
 0x127   :  { %v285_v32 = vadd.f32 %v1806_v7, %v284_v31  ;;  %v1402_v33 = vpop.f32.mrb[26].mxu0  ;;  %1443 = vmatprep.mubr.bf16.mxu1 %v357_v28 }
 0x128   :  { %v296_v34 = vadd.f32 %v1402_v33, %v1806_v7  ;;  %v287_v35 = vpop.f32.mrb[27].mxu0  ;;  %1444 = vmatmul.mubr.bf16.gmra.mrb[20].mxu1 %v358_v27  ;;  %v341_v37 = vmax.f32 %v293_v30, 0.0 }
 0x129   :  { %v288_v36 = vadd.f32 %v1806_v7, %v287_v35  ;;  %v339_v39 = vmax.f32 %v285_v32, 0.0 }
 0x12a   :  { %v342_v38 = vmax.f32 %v296_v34, 0.0 }
 0x12b   :  { %v340_v40 = vmax.f32 %v288_v36, 0.0 }
 0x12c   :  { %v360_v41 = vpack.c.bf16 %v342_v38, %v341_v37 }
 0x12d   :  { %v359_v42 = vpack.c.bf16 %v340_v40, %v339_v39  ;;  %v1405_v43 = vpop.f32.mrb[28].mxu0 }
 0x12e   :  { %v309_v44 = vadd.f32 %v1405_v43, %v1806_v7  ;;  %v300_v45 = vpop.f32.mrb[29].mxu0 }
 0x12f   :  { %v301_v46 = vadd.f32 %v1806_v7, %v300_v45  ;;  %v1406_v47 = vpop.f32.mrb[30].mxu0  ;;  %1447 = vmatprep.mubr.bf16.mxu1 %v359_v42 }
 0x130   :  { %v312_v48 = vadd.f32 %v1406_v47, %v1806_v7  ;;  %v303_v49 = vpop.f32.mrb[31].mxu0  ;;  %1448 = vmatmul.mubr.bf16.gmra.mrb[24].mxu1 %v360_v41  ;;  %v345_v51 = vmax.f32 %v309_v44, 0.0 }
 0x131   :  { %v304_v50 = vadd.f32 %v1806_v7, %v303_v49  ;;  %v343_v53 = vmax.f32 %v301_v46, 0.0  ;;  %v1576_v7 = vld [vmem:[%s2175_s7 + $0x8] sm:$0xff]  }
 0x132   :  { %v346_v52 = vmax.f32 %v312_v48, 0.0  ;;  %1505 = vmatprep.subr.bf16.mxu1 %v1576_v7 }
 0x133   :  { %v344_v54 = vmax.f32 %v304_v50, 0.0  ;;  %1506 = vmatpush3.bf16.msra.mxu1 %v1576_v7 }
 0x134   :  { %v362_v55 = vpack.c.bf16 %v346_v52, %v345_v51  ;;  %1507 = vmatprep.subr.bf16.mxu1 %v1577_v59 }
 0x135   :  { %v361_v56 = vpack.c.bf16 %v344_v54, %v343_v53 }
 0x137   :  { %1451 = vmatprep.mubr.bf16.mxu1 %v361_v56  ;;  %1508 = vmatpush3.bf16.msra.mxu1 %v1577_v59 }
 0x138   :  { %1452 = vmatmul.mubr.bf16.gmra.mrb[28].mxu1 %v362_v55  ;;  %1509 = vmatprep.subr.bf16.mxu1 %v1578_v60 }
 0x13b   :  { %1510 = vmatpush3.bf16.msra.mxu1 %v1578_v60 }
 0x13c   :  { %1511 = vmatprep.subr.bf16.mxu1 %v1579_v61 }
 0x13f   :  { %1512 = vmatpush3.bf16.msra.mxu1 %v1579_v61 }
 0x140   :  { %1513 = vmatprep.subr.bf16.mxu1 %v1580_v62 }
 0x143   :  { %1514 = vmatpush3.bf16.msra.mxu1 %v1580_v62 }
 0x144   :  { %1515 = vmatprep.subr.bf16.mxu1 %v1581_v63 }
 0x147   :  { %1516 = vmatpush3.bf16.msra.mxu1 %v1581_v63 }
 0x1d3   :  { %v1425_v1 = vpop.f32.mrb[0].mxu1 }
 0x1d4   :  { %v477_v2 = vadd.f32 %v1425_v1, %v1867_v0  ;;  %v468_v3 = vpop.f32.mrb[1].mxu1 }
 0x1d5   :  { %v469_v4 = vadd.f32 %v1867_v0, %v468_v3  ;;  %v1426_v5 = vpop.f32.mrb[2].mxu1 }
 0x1d6   :  { %v597_v6 = vmax.f32 %v477_v2, 0.0  ;;  %v480_v8 = vadd.f32 %v1426_v5, %v1867_v0  ;;  %v471_v9 = vpop.f32.mrb[3].mxu1 }
 0x1d7   :  { %v595_v10 = vmax.f32 %v469_v4, 0.0  ;;  %v472_v11 = vadd.f32 %v1867_v0, %v471_v9 }
 0x1d8   :  { %629 = vst [vmem:[%s2177_s10 + $0x10] sm:$0xff] %v597_v6  ;;  %v598_v12 = vmax.f32 %v480_v8, 0.0 }
 0x1d9   :  { %627 = vst [vmem:[%s2177_s10] sm:$0xff] %v595_v10  ;;  %v596_v13 = vmax.f32 %v472_v11, 0.0 }
 0x1da   :  { %630 = vst [vmem:[%s2177_s10 + $0x18] sm:$0xff] %v598_v12  ;;  %v660_v14 = vpack.c.bf16 %v598_v12, %v597_v6 }
 0x1db   :  { %628 = vst [vmem:[%s2177_s10 + $0x8] sm:$0xff] %v596_v13  ;;  %v659_v15 = vpack.c.bf16 %v596_v13, %v595_v10  ;;  %v1429_v16 = vpop.f32.mrb[4].mxu1 }
 0x1dc   :  { %v493_v17 = vadd.f32 %v1429_v16, %v1867_v0  ;;  %v484_v18 = vpop.f32.mrb[5].mxu1 }
 0x1dd   :  { %v485_v19 = vadd.f32 %v1867_v0, %v484_v18  ;;  %v1430_v20 = vpop.f32.mrb[6].mxu1  ;;  %1471 = vmatprep.mubr.bf16.mxu0 %v659_v15 }
 0x1de   :  { %v601_v21 = vmax.f32 %v493_v17, 0.0  ;;  %v496_v22 = vadd.f32 %v1430_v20, %v1867_v0  ;;  %v487_v23 = vpop.f32.mrb[7].mxu1  ;;  %1472 = vmatmul.mubr.bf16.vlgmr.msra.gmra.mrb[32].mxu0 %v660_v14 }
 0x1df   :  { %v599_v24 = vmax.f32 %v485_v19, 0.0  ;;  %v488_v25 = vadd.f32 %v1867_v0, %v487_v23 }
 0x1e0   :  { %633 = vst [vmem:[%s2177_s10 + $0x30] sm:$0xff] %v601_v21  ;;  %v602_v26 = vmax.f32 %v496_v22, 0.0 }
 0x1e1   :  { %631 = vst [vmem:[%s2177_s10 + $0x20] sm:$0xff] %v599_v24  ;;  %v600_v27 = vmax.f32 %v488_v25, 0.0 }
 0x1e2   :  { %634 = vst [vmem:[%s2177_s10 + $0x38] sm:$0xff] %v602_v26  ;;  %v662_v28 = vpack.c.bf16 %v602_v26, %v601_v21 }
 0x1e3   :  { %632 = vst [vmem:[%s2177_s10 + $0x28] sm:$0xff] %v600_v27  ;;  %v661_v29 = vpack.c.bf16 %v600_v27, %v599_v24  ;;  %v1433_v30 = vpop.f32.mrb[8].mxu1 }
 0x1e4   :  { %v509_v31 = vadd.f32 %v1433_v30, %v1867_v0  ;;  %v500_v32 = vpop.f32.mrb[9].mxu1 }
 0x1e5   :  { %v501_v33 = vadd.f32 %v1867_v0, %v500_v32  ;;  %v1434_v34 = vpop.f32.mrb[10].mxu1  ;;  %1475 = vmatprep.mubr.bf16.mxu0 %v661_v29 }
 0x1e6   :  { %v605_v35 = vmax.f32 %v509_v31, 0.0  ;;  %v512_v36 = vadd.f32 %v1434_v34, %v1867_v0  ;;  %v503_v37 = vpop.f32.mrb[11].mxu1  ;;  %1476 = vmatmul.mubr.bf16.gmra.mrb[36].mxu0 %v662_v28 }
 0x1e7   :  { %v603_v38 = vmax.f32 %v501_v33, 0.0  ;;  %v504_v39 = vadd.f32 %v1867_v0, %v503_v37 }
 0x1e8   :  { %637 = vst [vmem:[%s2177_s10 + $0x50] sm:$0xff] %v605_v35  ;;  %v606_v40 = vmax.f32 %v512_v36, 0.0 }
 0x1e9   :  { %635 = vst [vmem:[%s2177_s10 + $0x40] sm:$0xff] %v603_v38  ;;  %v604_v41 = vmax.f32 %v504_v39, 0.0 }
 0x1ea   :  { %638 = vst [vmem:[%s2177_s10 + $0x58] sm:$0xff] %v606_v40  ;;  %v664_v42 = vpack.c.bf16 %v606_v40, %v605_v35 }
 0x1eb   :  { %636 = vst [vmem:[%s2177_s10 + $0x48] sm:$0xff] %v604_v41  ;;  %v663_v43 = vpack.c.bf16 %v604_v41, %v603_v38  ;;  %v1437_v44 = vpop.f32.mrb[12].mxu1 }
 0x1ec   :  { %v525_v45 = vadd.f32 %v1437_v44, %v1867_v0  ;;  %v516_v46 = vpop.f32.mrb[13].mxu1 }
 0x1ed   :  { %v517_v47 = vadd.f32 %v1867_v0, %v516_v46  ;;  %v1438_v48 = vpop.f32.mrb[14].mxu1  ;;  %1479 = vmatprep.mubr.bf16.mxu0 %v663_v43 }
 0x1ee   :  { %v609_v49 = vmax.f32 %v525_v45, 0.0  ;;  %v528_v50 = vadd.f32 %v1438_v48, %v1867_v0  ;;  %v519_v51 = vpop.f32.mrb[15].mxu1  ;;  %1480 = vmatmul.mubr.bf16.gmra.mrb[40].mxu0 %v664_v42 }
 0x1ef   :  { %v607_v52 = vmax.f32 %v517_v47, 0.0  ;;  %v520_v53 = vadd.f32 %v1867_v0, %v519_v51  ;;  %v2003_v51 = vld [vmem:[%s2178_s6] ss:$0 sm:$0xff] }
 0x1f0   :  { %641 = vst [vmem:[%s2177_s10 + $0x70] sm:$0xff] %v609_v49  ;;  %v610_v54 = vmax.f32 %v528_v50, 0.0  ;;  %v1582_v50 = vld [vmem:[%s2175_s7 + $0x38] sm:$0xff]  }
 0x1f1   :  { %639 = vst [vmem:[%s2177_s10 + $0x60] sm:$0xff] %v607_v52  ;;  %v608_v55 = vmax.f32 %v520_v53, 0.0  ;;  %1517 = vmatprep.subr.bf16.mxu1 %v1582_v50 }
 0x1f2   :  { %642 = vst [vmem:[%s2177_s10 + $0x78] sm:$0xff] %v610_v54  ;;  %v666_v56 = vpack.c.bf16 %v610_v54, %v609_v49  ;;  %1518 = vmatpush3.bf16.msra.mxu1 %v1582_v50 }
 0x1f3   :  { %640 = vst [vmem:[%s2177_s10 + $0x68] sm:$0xff] %v608_v55  ;;  %v665_v57 = vpack.c.bf16 %v608_v55, %v607_v52  ;;  %v1441_v58 = vpop.f32.mrb[16].mxu1 }
 0x1f4   :  { %v541_v7 = vadd.f32 %v1441_v58, %v1867_v0  ;;  %v532_v59 = vpop.f32.mrb[17].mxu1 }
 0x1f5   :  { %v533_v60 = vadd.f32 %v1867_v0, %v532_v59  ;;  %v1442_v61 = vpop.f32.mrb[18].mxu1  ;;  %1483 = vmatprep.mubr.bf16.mxu0 %v665_v57 }
 0x1f6   :  { %v613_v62 = vmax.f32 %v541_v7, 0.0  ;;  %v544_v63 = vadd.f32 %v1442_v61, %v1867_v0  ;;  %v535_v1 = vpop.f32.mrb[19].mxu1  ;;  %1484 = vmatmul.mubr.bf16.gmra.mrb[44].mxu0 %v666_v56 }
 0x1f7   :  { %v611_v2 = vmax.f32 %v533_v60, 0.0  ;;  %v536_v3 = vadd.f32 %v1867_v0, %v535_v1 }
 0x1f8   :  { %645 = vst [vmem:[%s2177_s10 + $0x90] sm:$0xff] %v613_v62  ;;  %v614_v4 = vmax.f32 %v544_v63, 0.0 }
 0x1f9   :  { %643 = vst [vmem:[%s2177_s10 + $0x80] sm:$0xff] %v611_v2  ;;  %v612_v5 = vmax.f32 %v536_v3, 0.0 }
 0x1fa   :  { %646 = vst [vmem:[%s2177_s10 + $0x98] sm:$0xff] %v614_v4  ;;  %v668_v6 = vpack.c.bf16 %v614_v4, %v613_v62 }
 0x1fb   :  { %644 = vst [vmem:[%s2177_s10 + $0x88] sm:$0xff] %v612_v5  ;;  %v667_v8 = vpack.c.bf16 %v612_v5, %v611_v2  ;;  %v1445_v9 = vpop.f32.mrb[20].mxu1 }
 0x1fc   :  { %v557_v10 = vadd.f32 %v1445_v9, %v1867_v0  ;;  %v548_v11 = vpop.f32.mrb[21].mxu1 }
 0x1fd   :  { %v549_v12 = vadd.f32 %v1867_v0, %v548_v11  ;;  %v1446_v13 = vpop.f32.mrb[22].mxu1  ;;  %1487 = vmatprep.mubr.bf16.mxu0 %v667_v8 }
 0x1fe   :  { %v617_v14 = vmax.f32 %v557_v10, 0.0  ;;  %v560_v15 = vadd.f32 %v1446_v13, %v1867_v0  ;;  %v551_v16 = vpop.f32.mrb[23].mxu1  ;;  %1488 = vmatmul.mubr.bf16.gmra.mrb[48].mxu0 %v668_v6 }
 0x1ff   :  { %v615_v17 = vmax.f32 %v549_v12, 0.0  ;;  %v552_v18 = vadd.f32 %v1867_v0, %v551_v16 }
 0x200   :  { %649 = vst [vmem:[%s2177_s10 + $0xb0] sm:$0xff] %v617_v14  ;;  %v618_v19 = vmax.f32 %v560_v15, 0.0 }
 0x201   :  { %647 = vst [vmem:[%s2177_s10 + $0xa0] sm:$0xff] %v615_v17  ;;  %v616_v20 = vmax.f32 %v552_v18, 0.0 }
 0x202   :  { %650 = vst [vmem:[%s2177_s10 + $0xb8] sm:$0xff] %v618_v19  ;;  %v670_v21 = vpack.c.bf16 %v618_v19, %v617_v14 }
 0x203   :  { %648 = vst [vmem:[%s2177_s10 + $0xa8] sm:$0xff] %v616_v20  ;;  %v669_v22 = vpack.c.bf16 %v616_v20, %v615_v17  ;;  %v1449_v23 = vpop.f32.mrb[24].mxu1 }
 0x204   :  { %v573_v24 = vadd.f32 %v1449_v23, %v1867_v0  ;;  %v564_v25 = vpop.f32.mrb[25].mxu1 }
 0x205   :  { %v565_v26 = vadd.f32 %v1867_v0, %v564_v25  ;;  %v1450_v27 = vpop.f32.mrb[26].mxu1  ;;  %1491 = vmatprep.mubr.bf16.mxu0 %v669_v22 }
 0x206   :  { %v621_v28 = vmax.f32 %v573_v24, 0.0  ;;  %v576_v29 = vadd.f32 %v1450_v27, %v1867_v0  ;;  %v567_v30 = vpop.f32.mrb[27].mxu1  ;;  %1492 = vmatmul.mubr.bf16.gmra.mrb[52].mxu0 %v670_v21 }
 0x207   :  { %v619_v31 = vmax.f32 %v565_v26, 0.0  ;;  %v568_v32 = vadd.f32 %v1867_v0, %v567_v30 }
 0x208   :  { %653 = vst [vmem:[%s2177_s10 + $0xd0] sm:$0xff] %v621_v28  ;;  %v622_v33 = vmax.f32 %v576_v29, 0.0 }
 0x209   :  { %651 = vst [vmem:[%s2177_s10 + $0xc0] sm:$0xff] %v619_v31  ;;  %v620_v34 = vmax.f32 %v568_v32, 0.0 }
 0x20a   :  { %654 = vst [vmem:[%s2177_s10 + $0xd8] sm:$0xff] %v622_v33  ;;  %v672_v35 = vpack.c.bf16 %v622_v33, %v621_v28 }
 0x20b   :  { %652 = vst [vmem:[%s2177_s10 + $0xc8] sm:$0xff] %v620_v34  ;;  %v671_v36 = vpack.c.bf16 %v620_v34, %v619_v31  ;;  %v1453_v37 = vpop.f32.mrb[28].mxu1 }
 0x20c   :  { %v589_v38 = vadd.f32 %v1453_v37, %v1867_v0  ;;  %v580_v39 = vpop.f32.mrb[29].mxu1 }
 0x20d   :  { %v581_v40 = vadd.f32 %v1867_v0, %v580_v39  ;;  %v1454_v41 = vpop.f32.mrb[30].mxu1  ;;  %1495 = vmatprep.mubr.bf16.mxu0 %v671_v36 }
 0x20e   :  { %v625_v42 = vmax.f32 %v589_v38, 0.0  ;;  %v592_v43 = vadd.f32 %v1454_v41, %v1867_v0  ;;  %v583_v44 = vpop.f32.mrb[31].mxu1  ;;  %1496 = vmatmul.mubr.bf16.gmra.mrb[56].mxu0 %v672_v35 }
 0x20f   :  { %v623_v45 = vmax.f32 %v581_v40, 0.0  ;;  %v584_v46 = vadd.f32 %v1867_v0, %v583_v44 }
 0x210   :  { %657 = vst [vmem:[%s2177_s10 + $0xf0] sm:$0xff] %v625_v42  ;;  %v626_v47 = vmax.f32 %v592_v43, 0.0 }
 0x211   :  { %655 = vst [vmem:[%s2177_s10 + $0xe0] sm:$0xff] %v623_v45  ;;  %v624_v48 = vmax.f32 %v584_v46, 0.0 }
 0x212   :  { %658 = vst [vmem:[%s2177_s10 + $0xf8] sm:$0xff] %v626_v47  ;;  %v674_v49 = vpack.c.bf16 %v626_v47, %v625_v42 }
 0x213   :  { %656 = vst [vmem:[%s2177_s10 + $0xe8] sm:$0xff] %v624_v48  ;;  %v673_v0 = vpack.c.bf16 %v624_v48, %v623_v45 }
 0x215   :  { %1499 = vmatprep.mubr.bf16.mxu0 %v673_v0 }
 0x216   :  { %1500 = vmatmul.mubr.bf16.gmra.mrb[60].mxu0 %v674_v49 }
 0x2b1   :  { %v1473_v52 = vpop.f32.mrb[32].mxu0 }
 0x2b2   :  { %v789_v53 = vadd.f32 %v1473_v52, %v2003_v51  ;;  %v780_v54 = vpop.f32.mrb[33].mxu0 }
 0x2b3   :  { %v781_v55 = vadd.f32 %v2003_v51, %v780_v54  ;;  %v1474_v56 = vpop.f32.mrb[34].mxu0 }
 0x2b4   :  { %v792_v57 = vadd.f32 %v1474_v56, %v2003_v51  ;;  %v783_v58 = vpop.f32.mrb[35].mxu0  ;;  %v909_v59 = vmax.f32 %v789_v53, 0.0 }
 0x2b5   :  { %v784_v7 = vadd.f32 %v2003_v51, %v783_v58  ;;  %v907_v61 = vmax.f32 %v781_v55, 0.0 }
 0x2b6   :  { %v910_v60 = vmax.f32 %v792_v57, 0.0 }
 0x2b7   :  { %v908_v62 = vmax.f32 %v784_v7, 0.0 }
 0x2b8   :  { %v940_v63 = vpack.c.bf16 %v910_v60, %v909_v59 }
 0x2b9   :  { %v939_v1 = vpack.c.bf16 %v908_v62, %v907_v61  ;;  %v1477_v2 = vpop.f32.mrb[36].mxu0 }
 0x2ba   :  { %v805_v3 = vadd.f32 %v1477_v2, %v2003_v51  ;;  %v796_v4 = vpop.f32.mrb[37].mxu0 }
 0x2bb   :  { %v797_v5 = vadd.f32 %v2003_v51, %v796_v4  ;;  %v1478_v6 = vpop.f32.mrb[38].mxu0  ;;  %1519 = vmatprep.mubr.bf16.mxu1 %v939_v1 }
 0x2bc   :  { %v808_v8 = vadd.f32 %v1478_v6, %v2003_v51  ;;  %v799_v9 = vpop.f32.mrb[39].mxu0  ;;  %1520 = vmatmul.mubr.bf16.vlgmr.msra.gmra.mrb[32].mxu1 %v940_v63  ;;  %v913_v11 = vmax.f32 %v805_v3, 0.0 }
 0x2bd   :  { %v800_v10 = vadd.f32 %v2003_v51, %v799_v9  ;;  %v911_v13 = vmax.f32 %v797_v5, 0.0 }
 0x2be   :  { %v914_v12 = vmax.f32 %v808_v8, 0.0 }
 0x2bf   :  { %v912_v14 = vmax.f32 %v800_v10, 0.0 }
 0x2c0   :  { %v942_v15 = vpack.c.bf16 %v914_v12, %v913_v11 }
 0x2c1   :  { %v941_v16 = vpack.c.bf16 %v912_v14, %v911_v13  ;;  %v1481_v17 = vpop.f32.mrb[40].mxu0 }
 0x2c2   :  { %v821_v18 = vadd.f32 %v1481_v17, %v2003_v51  ;;  %v812_v19 = vpop.f32.mrb[41].mxu0 }
 0x2c3   :  { %v813_v20 = vadd.f32 %v2003_v51, %v812_v19  ;;  %v1482_v21 = vpop.f32.mrb[42].mxu0  ;;  %1523 = vmatprep.mubr.bf16.mxu1 %v941_v16 }
 0x2c4   :  { %v824_v22 = vadd.f32 %v1482_v21, %v2003_v51  ;;  %v815_v23 = vpop.f32.mrb[43].mxu0  ;;  %1524 = vmatmul.mubr.bf16.gmra.mrb[36].mxu1 %v942_v15  ;;  %v917_v25 = vmax.f32 %v821_v18, 0.0 }
 0x2c5   :  { %v816_v24 = vadd.f32 %v2003_v51, %v815_v23  ;;  %v915_v27 = vmax.f32 %v813_v20, 0.0 }
 0x2c6   :  { %v918_v26 = vmax.f32 %v824_v22, 0.0 }
 0x2c7   :  { %v916_v28 = vmax.f32 %v816_v24, 0.0 }
 0x2c8   :  { %v944_v29 = vpack.c.bf16 %v918_v26, %v917_v25 }
 0x2c9   :  { %v943_v30 = vpack.c.bf16 %v916_v28, %v915_v27  ;;  %v1485_v31 = vpop.f32.mrb[44].mxu0 }
 0x2ca   :  { %v837_v32 = vadd.f32 %v1485_v31, %v2003_v51  ;;  %v828_v33 = vpop.f32.mrb[45].mxu0 }
 0x2cb   :  { %v829_v34 = vadd.f32 %v2003_v51, %v828_v33  ;;  %v1486_v35 = vpop.f32.mrb[46].mxu0  ;;  %1527 = vmatprep.mubr.bf16.mxu1 %v943_v30 }
 0x2cc   :  { %v840_v36 = vadd.f32 %v1486_v35, %v2003_v51  ;;  %v831_v37 = vpop.f32.mrb[47].mxu0  ;;  %1528 = vmatmul.mubr.bf16.gmra.mrb[40].mxu1 %v944_v29  ;;  %v921_v39 = vmax.f32 %v837_v32, 0.0 }
 0x2cd   :  { %v832_v38 = vadd.f32 %v2003_v51, %v831_v37  ;;  %v919_v41 = vmax.f32 %v829_v34, 0.0 }
 0x2ce   :  { %v922_v40 = vmax.f32 %v840_v36, 0.0 }
 0x2cf   :  { %v920_v42 = vmax.f32 %v832_v38, 0.0  ;;  %v2040_v38 = vld [vmem:[%s2179_s8] ss:$0 sm:$0xff] }
 0x2d0   :  { %v946_v43 = vpack.c.bf16 %v922_v40, %v921_v39 }
 0x2d1   :  { %v945_v44 = vpack.c.bf16 %v920_v42, %v919_v41  ;;  %v1489_v45 = vpop.f32.mrb[48].mxu0 }
 0x2d2   :  { %v853_v46 = vadd.f32 %v1489_v45, %v2003_v51  ;;  %v844_v47 = vpop.f32.mrb[49].mxu0 }
 0x2d3   :  { %v845_v48 = vadd.f32 %v2003_v51, %v844_v47  ;;  %v1490_v49 = vpop.f32.mrb[50].mxu0  ;;  %1531 = vmatprep.mubr.bf16.mxu1 %v945_v44 }
 0x2d4   :  { %v856_v0 = vadd.f32 %v1490_v49, %v2003_v51  ;;  %v847_v50 = vpop.f32.mrb[51].mxu0  ;;  %1532 = vmatmul.mubr.bf16.gmra.mrb[44].mxu1 %v946_v43  ;;  %v925_v53 = vmax.f32 %v853_v46, 0.0 }
 0x2d5   :  { %v848_v52 = vadd.f32 %v2003_v51, %v847_v50  ;;  %v923_v55 = vmax.f32 %v845_v48, 0.0 }
 0x2d6   :  { %v926_v54 = vmax.f32 %v856_v0, 0.0 }
 0x2d7   :  { %v924_v56 = vmax.f32 %v848_v52, 0.0 }
 0x2d8   :  { %v948_v57 = vpack.c.bf16 %v926_v54, %v925_v53 }
 0x2d9   :  { %v947_v58 = vpack.c.bf16 %v924_v56, %v923_v55  ;;  %v1493_v7 = vpop.f32.mrb[52].mxu0 }
 0x2da   :  { %v869_v59 = vadd.f32 %v1493_v7, %v2003_v51  ;;  %v860_v60 = vpop.f32.mrb[53].mxu0 }
 0x2db   :  { %v861_v61 = vadd.f32 %v2003_v51, %v860_v60  ;;  %v1494_v62 = vpop.f32.mrb[54].mxu0  ;;  %1535 = vmatprep.mubr.bf16.mxu1 %v947_v58 }
 0x2dc   :  { %v872_v63 = vadd.f32 %v1494_v62, %v2003_v51  ;;  %v863_v1 = vpop.f32.mrb[55].mxu0  ;;  %1536 = vmatmul.mubr.bf16.gmra.mrb[48].mxu1 %v948_v57  ;;  %v929_v3 = vmax.f32 %v869_v59, 0.0 }
 0x2dd   :  { %v864_v2 = vadd.f32 %v2003_v51, %v863_v1  ;;  %v927_v5 = vmax.f32 %v861_v61, 0.0 }
 0x2de   :  { %v930_v4 = vmax.f32 %v872_v63, 0.0 }
 0x2df   :  { %v928_v6 = vmax.f32 %v864_v2, 0.0 }
 0x2e0   :  { %v950_v8 = vpack.c.bf16 %v930_v4, %v929_v3 }
 0x2e1   :  { %v949_v9 = vpack.c.bf16 %v928_v6, %v927_v5  ;;  %v1497_v10 = vpop.f32.mrb[56].mxu0 }
 0x2e2   :  { %v885_v11 = vadd.f32 %v1497_v10, %v2003_v51  ;;  %v876_v12 = vpop.f32.mrb[57].mxu0 }
 0x2e3   :  { %v877_v13 = vadd.f32 %v2003_v51, %v876_v12  ;;  %v1498_v14 = vpop.f32.mrb[58].mxu0  ;;  %1539 = vmatprep.mubr.bf16.mxu1 %v949_v9 }
 0x2e4   :  { %v888_v15 = vadd.f32 %v1498_v14, %v2003_v51  ;;  %v879_v16 = vpop.f32.mrb[59].mxu0  ;;  %1540 = vmatmul.mubr.bf16.gmra.mrb[52].mxu1 %v950_v8  ;;  %v933_v18 = vmax.f32 %v885_v11, 0.0 }
 0x2e5   :  { %v880_v17 = vadd.f32 %v2003_v51, %v879_v16  ;;  %v931_v20 = vmax.f32 %v877_v13, 0.0 }
 0x2e6   :  { %v934_v19 = vmax.f32 %v888_v15, 0.0 }
 0x2e7   :  { %v932_v21 = vmax.f32 %v880_v17, 0.0 }
 0x2e8   :  { %v952_v22 = vpack.c.bf16 %v934_v19, %v933_v18 }
 0x2e9   :  { %v951_v23 = vpack.c.bf16 %v932_v21, %v931_v20  ;;  %v1501_v24 = vpop.f32.mrb[60].mxu0 }
 0x2ea   :  { %v901_v25 = vadd.f32 %v1501_v24, %v2003_v51  ;;  %v892_v26 = vpop.f32.mrb[61].mxu0 }
 0x2eb   :  { %v893_v27 = vadd.f32 %v2003_v51, %v892_v26  ;;  %v1502_v28 = vpop.f32.mrb[62].mxu0  ;;  %1543 = vmatprep.mubr.bf16.mxu1 %v951_v23 }
 0x2ec   :  { %v904_v29 = vadd.f32 %v1502_v28, %v2003_v51  ;;  %v895_v30 = vpop.f32.mrb[63].mxu0  ;;  %1544 = vmatmul.mubr.bf16.gmra.mrb[56].mxu1 %v952_v22  ;;  %v937_v32 = vmax.f32 %v901_v25, 0.0 }
 0x2ed   :  { %v896_v31 = vadd.f32 %v2003_v51, %v895_v30  ;;  %v935_v34 = vmax.f32 %v893_v27, 0.0 }
 0x2ee   :  { %v938_v33 = vmax.f32 %v904_v29, 0.0 }
 0x2ef   :  { %v936_v35 = vmax.f32 %v896_v31, 0.0 }
 0x2f0   :  { %v954_v36 = vpack.c.bf16 %v938_v33, %v937_v32 }
 0x2f1   :  { %v953_v37 = vpack.c.bf16 %v936_v35, %v935_v34 }
 0x2f3   :  { %1547 = vmatprep.mubr.bf16.mxu1 %v953_v37 }
 0x2f4   :  { %1548 = vmatmul.mubr.bf16.gmra.mrb[60].mxu1 %v954_v36 }
 0x38f   :  { %v1521_v39 = vpop.f32.mrb[32].mxu1 }
 0x390   :  { %v1069_v40 = vadd.f32 %v1521_v39, %v2040_v38  ;;  %v1060_v41 = vpop.f32.mrb[33].mxu1 }
 0x391   :  { %v1061_v42 = vadd.f32 %v2040_v38, %v1060_v41  ;;  %v1522_v51 = vpop.f32.mrb[34].mxu1 }
 0x392   :  { %1189 = vst [vmem:[%s2180_s9 + $0x10] sm:$0xff] %v1069_v40  ;;  %v1072_v43 = vadd.f32 %v1522_v51, %v2040_v38  ;;  %v1063_v44 = vpop.f32.mrb[35].mxu1 }
 0x393   :  { %1187 = vst [vmem:[%s2180_s9] sm:$0xff] %v1061_v42  ;;  %v1064_v45 = vadd.f32 %v2040_v38, %v1063_v44 }
 0x394   :  { %1190 = vst [vmem:[%s2180_s9 + $0x18] sm:$0xff] %v1072_v43 }
 0x395   :  { %1188 = vst [vmem:[%s2180_s9 + $0x8] sm:$0xff] %v1064_v45 }
 0x397   :  { %v1525_v46 = vpop.f32.mrb[36].mxu1 }
 0x398   :  { %v1085_v47 = vadd.f32 %v1525_v46, %v2040_v38  ;;  %v1076_v48 = vpop.f32.mrb[37].mxu1 }
 0x399   :  { %v1077_v49 = vadd.f32 %v2040_v38, %v1076_v48  ;;  %v1526_v0 = vpop.f32.mrb[38].mxu1 }
 0x39a   :  { %1193 = vst [vmem:[%s2180_s9 + $0x30] sm:$0xff] %v1085_v47  ;;  %v1088_v50 = vadd.f32 %v1526_v0, %v2040_v38  ;;  %v1079_v52 = vpop.f32.mrb[39].mxu1 }
 0x39b   :  { %1191 = vst [vmem:[%s2180_s9 + $0x20] sm:$0xff] %v1077_v49  ;;  %v1080_v53 = vadd.f32 %v2040_v38, %v1079_v52 }
 0x39c   :  { %1194 = vst [vmem:[%s2180_s9 + $0x38] sm:$0xff] %v1088_v50 }
 0x39d   :  { %1192 = vst [vmem:[%s2180_s9 + $0x28] sm:$0xff] %v1080_v53 }
 0x39f   :  { %v1529_v54 = vpop.f32.mrb[40].mxu1 }
 0x3a0   :  { %v1101_v55 = vadd.f32 %v1529_v54, %v2040_v38  ;;  %v1092_v56 = vpop.f32.mrb[41].mxu1 }
 0x3a1   :  { %v1093_v57 = vadd.f32 %v2040_v38, %v1092_v56  ;;  %v1530_v58 = vpop.f32.mrb[42].mxu1 }
 0x3a2   :  { %1197 = vst [vmem:[%s2180_s9 + $0x50] sm:$0xff] %v1101_v55  ;;  %v1104_v7 = vadd.f32 %v1530_v58, %v2040_v38  ;;  %v1095_v59 = vpop.f32.mrb[43].mxu1 }
 0x3a3   :  { %1195 = vst [vmem:[%s2180_s9 + $0x40] sm:$0xff] %v1093_v57  ;;  %v1096_v60 = vadd.f32 %v2040_v38, %v1095_v59 }
 0x3a4   :  { %1198 = vst [vmem:[%s2180_s9 + $0x58] sm:$0xff] %v1104_v7 }
 0x3a5   :  { %1196 = vst [vmem:[%s2180_s9 + $0x48] sm:$0xff] %v1096_v60 }
 0x3a7   :  { %v1533_v61 = vpop.f32.mrb[44].mxu1 }
 0x3a8   :  { %v1117_v62 = vadd.f32 %v1533_v61, %v2040_v38  ;;  %v1108_v63 = vpop.f32.mrb[45].mxu1 }
 0x3a9   :  { %v1109_v1 = vadd.f32 %v2040_v38, %v1108_v63  ;;  %v1534_v2 = vpop.f32.mrb[46].mxu1 }
 0x3aa   :  { %1201 = vst [vmem:[%s2180_s9 + $0x70] sm:$0xff] %v1117_v62  ;;  %v1120_v3 = vadd.f32 %v1534_v2, %v2040_v38  ;;  %v1111_v4 = vpop.f32.mrb[47].mxu1 }
 0x3ab   :  { %1199 = vst [vmem:[%s2180_s9 + $0x60] sm:$0xff] %v1109_v1  ;;  %v1112_v5 = vadd.f32 %v2040_v38, %v1111_v4 }
 0x3ac   :  { %1202 = vst [vmem:[%s2180_s9 + $0x78] sm:$0xff] %v1120_v3 }
 0x3ad   :  { %1200 = vst [vmem:[%s2180_s9 + $0x68] sm:$0xff] %v1112_v5 }
 0x3af   :  { %v1537_v6 = vpop.f32.mrb[48].mxu1 }
 0x3b0   :  { %v1133_v8 = vadd.f32 %v1537_v6, %v2040_v38  ;;  %v1124_v9 = vpop.f32.mrb[49].mxu1 }
 0x3b1   :  { %v1125_v10 = vadd.f32 %v2040_v38, %v1124_v9  ;;  %v1538_v11 = vpop.f32.mrb[50].mxu1 }
 0x3b2   :  { %1205 = vst [vmem:[%s2180_s9 + $0x90] sm:$0xff] %v1133_v8  ;;  %v1136_v12 = vadd.f32 %v1538_v11, %v2040_v38  ;;  %v1127_v13 = vpop.f32.mrb[51].mxu1 }
 0x3b3   :  { %1203 = vst [vmem:[%s2180_s9 + $0x80] sm:$0xff] %v1125_v10  ;;  %v1128_v14 = vadd.f32 %v2040_v38, %v1127_v13 }
 0x3b4   :  { %1206 = vst [vmem:[%s2180_s9 + $0x98] sm:$0xff] %v1136_v12 }
 0x3b5   :  { %1204 = vst [vmem:[%s2180_s9 + $0x88] sm:$0xff] %v1128_v14 }
 0x3b7   :  { %v1541_v15 = vpop.f32.mrb[52].mxu1 }
 0x3b8   :  { %v1149_v16 = vadd.f32 %v1541_v15, %v2040_v38  ;;  %v1140_v17 = vpop.f32.mrb[53].mxu1 }
 0x3b9   :  { %v1141_v18 = vadd.f32 %v2040_v38, %v1140_v17  ;;  %v1542_v19 = vpop.f32.mrb[54].mxu1 }
 0x3ba   :  { %1209 = vst [vmem:[%s2180_s9 + $0xb0] sm:$0xff] %v1149_v16  ;;  %v1152_v20 = vadd.f32 %v1542_v19, %v2040_v38  ;;  %v1143_v21 = vpop.f32.mrb[55].mxu1 }
 0x3bb   :  { %1207 = vst [vmem:[%s2180_s9 + $0xa0] sm:$0xff] %v1141_v18  ;;  %v1144_v22 = vadd.f32 %v2040_v38, %v1143_v21 }
 0x3bc   :  { %1210 = vst [vmem:[%s2180_s9 + $0xb8] sm:$0xff] %v1152_v20 }
 0x3bd   :  { %1208 = vst [vmem:[%s2180_s9 + $0xa8] sm:$0xff] %v1144_v22 }
 0x3bf   :  { %v1545_v23 = vpop.f32.mrb[56].mxu1 }
 0x3c0   :  { %v1165_v24 = vadd.f32 %v1545_v23, %v2040_v38  ;;  %v1156_v25 = vpop.f32.mrb[57].mxu1 }
 0x3c1   :  { %v1157_v26 = vadd.f32 %v2040_v38, %v1156_v25  ;;  %v1546_v27 = vpop.f32.mrb[58].mxu1 }
 0x3c2   :  { %1213 = vst [vmem:[%s2180_s9 + $0xd0] sm:$0xff] %v1165_v24  ;;  %v1168_v28 = vadd.f32 %v1546_v27, %v2040_v38  ;;  %v1159_v29 = vpop.f32.mrb[59].mxu1 }
 0x3c3   :  { %1211 = vst [vmem:[%s2180_s9 + $0xc0] sm:$0xff] %v1157_v26  ;;  %v1160_v30 = vadd.f32 %v2040_v38, %v1159_v29 }
 0x3c4   :  { %1214 = vst [vmem:[%s2180_s9 + $0xd8] sm:$0xff] %v1168_v28 }
 0x3c5   :  { %1212 = vst [vmem:[%s2180_s9 + $0xc8] sm:$0xff] %v1160_v30 }
 0x3c7   :  { %v1549_v31 = vpop.f32.mrb[60].mxu1 }
 0x3c8   :  { %v1181_v32 = vadd.f32 %v1549_v31, %v2040_v38  ;;  %v1172_v33 = vpop.f32.mrb[61].mxu1 }
 0x3c9   :  { %v1173_v34 = vadd.f32 %v2040_v38, %v1172_v33  ;;  %v1550_v35 = vpop.f32.mrb[62].mxu1 }
 0x3ca   :  { %1217 = vst [vmem:[%s2180_s9 + $0xf0] sm:$0xff] %v1181_v32  ;;  %v1184_v36 = vadd.f32 %v1550_v35, %v2040_v38  ;;  %v1175_v37 = vpop.f32.mrb[63].mxu1 }
 0x3cb   :  { %1215 = vst [vmem:[%s2180_s9 + $0xe0] sm:$0xff] %v1173_v34  ;;  %v1176_v39 = vadd.f32 %v2040_v38, %v1175_v37 }
 0x3cc   :  { %1218 = vst [vmem:[%s2180_s9 + $0xf8] sm:$0xff] %v1184_v36 }
 0x3cd   :  { %1216 = vst [vmem:[%s2180_s9 + $0xe8] sm:$0xff] %v1176_v39 }

// kernel: _forward_impl.1
= control target key start
LH: loop header
LB: loop body
LE: loop exit
PB: predicated region body
PF: predicated region fallthrough
CT: control target
= control target key end

     0   :  { %s2170_s1 = inlined_call_operand.vmem [shape: bf16[128,128], index: 1, kind: input, shape index: {}]   ;;  %s2171_s0 = inlined_call_operand.vmem [shape: f32[256,128], index: 0, kind: input, shape index: {}]   ;;  %s2172_s3 = inlined_call_operand.vmem [shape: bf16[128,128], index: 3, kind: input, shape index: {}]   ;;  %s2173_s5 = inlined_call_operand.vmem [shape: bf16[128,128], index: 5, kind: input, shape index: {}]   ;;  %s2174_s2 = inlined_call_operand.vmem [shape: f32[1,128], index: 2, kind: input, shape index: {}]   ;;  %s2175_s7 = inlined_call_operand.vmem [shape: bf16[128,128], index: 7, kind: input, shape index: {}]   ;;  %s2176_s4 = inlined_call_operand.vmem [shape: f32[1,128], index: 4, kind: input, shape index: {}]   ;;  %s2177_s10 = inlined_call_operand.vmem [shape: f32[256,128], index: 10, kind: output, shape index: {1}]   ;;  %s2178_s6 = inlined_call_operand.vmem [shape: f32[1,128], index: 6, kind: input, shape index: {}]   ;;  %s2179_s8 = inlined_call_operand.vmem [shape: f32[1,128], index: 8, kind: input, shape index: {}]   ;;  %s2180_s9 = inlined_call_operand.vmem [shape: f32[256,128], index: 9, kind: output, shape index: {0}]  }
   0x1   :  { %v1551_v0 = vld [vmem:[%s2170_s1] sm:$0xff]   ;;  %v1552_v1 = vld [vmem:[%s2170_s1 + $0x8] sm:$0xff]   ;;  %v1553_v2 = vld [vmem:[%s2170_s1 + $0x10] sm:$0xff]  }
   0x2   :  { %1359 = vmatprep.subr.bf16.mxu0 %v1551_v0  ;;  %v1554_v3 = vld [vmem:[%s2170_s1 + $0x18] sm:$0xff]   ;;  %v35_v4 = vld [vmem:[%s2171_s0] sm:$0xff]  ;;  %v36_v5 = vld [vmem:[%s2171_s0 + $0x8] sm:$0xff] }
   0x3   :  { %1360 = vmatpush3.bf16.msra.mxu0 %v1551_v0  ;;  %v67_v6 = vpack.c.bf16 %v36_v5, %v35_v4  ;;  %v1555_v7 = vld [vmem:[%s2170_s1 + $0x20] sm:$0xff]   ;;  %v1556_v8 = vld [vmem:[%s2170_s1 + $0x28] sm:$0xff]   ;;  %v1557_v9 = vld [vmem:[%s2170_s1 + $0x30] sm:$0xff]  }
   0x4   :  { %1361 = vmatprep.subr.bf16.mxu0 %v1552_v1  ;;  %v1559_v10 = vld [vmem:[%s2172_s3] sm:$0xff]   ;;  %v1560_v11 = vld [vmem:[%s2172_s3 + $0x8] sm:$0xff]   ;;  %v1561_v12 = vld [vmem:[%s2172_s3 + $0x10] sm:$0xff]  }
   0x5   :  { %1375 = vmatprep.mubr.bf16.mxu0 %v67_v6  ;;  %1407 = vmatprep.subr.bf16.mxu1 %v1559_v10  ;;  %v1558_v13 = vld [vmem:[%s2170_s1 + $0x38] sm:$0xff]   ;;  %v37_v14 = vld [vmem:[%s2171_s0 + $0x10] sm:$0xff]  ;;  %v39_v17 = vld [vmem:[%s2171_s0 + $0x20] sm:$0xff] }
   0x6   :  { %1408 = vmatpush3.bf16.msra.mxu1 %v1559_v10  ;;  %v38_v15 = vld [vmem:[%s2171_s0 + $0x18] sm:$0xff]  ;;  %v40_v18 = vld [vmem:[%s2171_s0 + $0x28] sm:$0xff]  ;;  %v1563_v21 = vld [vmem:[%s2172_s3 + $0x20] sm:$0xff]  }
   0x7   :  { %1362 = vmatpush3.bf16.msra.mxu0 %v1552_v1  ;;  %1409 = vmatprep.subr.bf16.mxu1 %v1560_v11  ;;  %v1562_v16 = vld [vmem:[%s2172_s3 + $0x18] sm:$0xff]   ;;  %v68_v19 = vpack.c.bf16 %v38_v15, %v37_v14  ;;  %v69_v20 = vpack.c.bf16 %v40_v18, %v39_v17  ;;  %v41_v22 = vld [vmem:[%s2171_s0 + $0x30] sm:$0xff]  ;;  %v1564_v24 = vld [vmem:[%s2172_s3 + $0x28] sm:$0xff]  }
   0x8   :  { %1363 = vmatprep.subr.bf16.mxu0 %v1553_v2  ;;  %v42_v23 = vld [vmem:[%s2171_s0 + $0x38] sm:$0xff]  ;;  %v43_v25 = vld [vmem:[%s2171_s0 + $0x40] sm:$0xff]  ;;  %v44_v26 = vld [vmem:[%s2171_s0 + $0x48] sm:$0xff] }
   0x9   :  { %v70_v27 = vpack.c.bf16 %v42_v23, %v41_v22  ;;  %v71_v28 = vpack.c.bf16 %v44_v26, %v43_v25  ;;  %v45_v29 = vld [vmem:[%s2171_s0 + $0x50] sm:$0xff]  ;;  %v46_v30 = vld [vmem:[%s2171_s0 + $0x58] sm:$0xff]  ;;  %v47_v31 = vld [vmem:[%s2171_s0 + $0x60] sm:$0xff] }
   0xa   :  { %1410 = vmatpush3.bf16.msra.mxu1 %v1560_v11  ;;  %v48_v32 = vld [vmem:[%s2171_s0 + $0x68] sm:$0xff]  ;;  %v72_v33 = vpack.c.bf16 %v46_v30, %v45_v29  ;;  %v49_v35 = vld [vmem:[%s2171_s0 + $0x70] sm:$0xff]  ;;  %v50_v36 = vld [vmem:[%s2171_s0 + $0x78] sm:$0xff] }
   0xb   :  { %1364 = vmatpush3.bf16.msra.mxu0 %v1553_v2  ;;  %1411 = vmatprep.subr.bf16.mxu1 %v1561_v12  ;;  %v73_v34 = vpack.c.bf16 %v48_v32, %v47_v31  ;;  %v51_v37 = vld [vmem:[%s2171_s0 + $0x80] sm:$0xff]  ;;  %v52_v38 = vld [vmem:[%s2171_s0 + $0x88] sm:$0xff]  ;;  %v74_v39 = vpack.c.bf16 %v50_v36, %v49_v35  ;;  %v53_v41 = vld [vmem:[%s2171_s0 + $0x90] sm:$0xff] }
   0xc   :  { %1365 = vmatprep.subr.bf16.mxu0 %v1554_v3  ;;  %v75_v40 = vpack.c.bf16 %v52_v38, %v51_v37  ;;  %v54_v42 = vld [vmem:[%s2171_s0 + $0x98] sm:$0xff]  ;;  %v55_v43 = vld [vmem:[%s2171_s0 + $0xa0] sm:$0xff]  ;;  %v56_v44 = vld [vmem:[%s2171_s0 + $0xa8] sm:$0xff] }
   0xd   :  { %v76_v45 = vpack.c.bf16 %v54_v42, %v53_v41  ;;  %v77_v46 = vpack.c.bf16 %v56_v44, %v55_v43  ;;  %v57_v47 = vld [vmem:[%s2171_s0 + $0xb0] sm:$0xff]  ;;  %v58_v48 = vld [vmem:[%s2171_s0 + $0xb8] sm:$0xff]  ;;  %v59_v49 = vld [vmem:[%s2171_s0 + $0xc0] sm:$0xff] }
   0xe   :  { %1412 = vmatpush3.bf16.msra.mxu1 %v1561_v12  ;;  %v60_v50 = vld [vmem:[%s2171_s0 + $0xc8] sm:$0xff]  ;;  %v78_v51 = vpack.c.bf16 %v58_v48, %v57_v47  ;;  %v61_v53 = vld [vmem:[%s2171_s0 + $0xd0] sm:$0xff]  ;;  %v62_v54 = vld [vmem:[%s2171_s0 + $0xd8] sm:$0xff] }
   0xf   :  { %1366 = vmatpush3.bf16.msra.mxu0 %v1554_v3  ;;  %1413 = vmatprep.subr.bf16.mxu1 %v1562_v16  ;;  %v79_v52 = vpack.c.bf16 %v60_v50, %v59_v49  ;;  %v63_v55 = vld [vmem:[%s2171_s0 + $0xe0] sm:$0xff]  ;;  %v64_v56 = vld [vmem:[%s2171_s0 + $0xe8] sm:$0xff]  ;;  %v80_v57 = vpack.c.bf16 %v62_v54, %v61_v53  ;;  %v65_v59 = vld [vmem:[%s2171_s0 + $0xf0] sm:$0xff] }
  0x10   :  { %1367 = vmatprep.subr.bf16.mxu0 %v1555_v7  ;;  %v81_v58 = vpack.c.bf16 %v64_v56, %v63_v55  ;;  %v66_v60 = vld [vmem:[%s2171_s0 + $0xf8] sm:$0xff]  ;;  %v1565_v62 = vld [vmem:[%s2172_s3 + $0x30] sm:$0xff]   ;;  %v1567_v0 = vld [vmem:[%s2173_s5] sm:$0xff]  }
  0x11   :  { %v82_v61 = vpack.c.bf16 %v66_v60, %v65_v59  ;;  %v1566_v63 = vld [vmem:[%s2172_s3 + $0x38] sm:$0xff]   ;;  %v1568_v1 = vld [vmem:[%s2173_s5 + $0x8] sm:$0xff]   ;;  %v1569_v2 = vld [vmem:[%s2173_s5 + $0x10] sm:$0xff]  }
  0x12   :  { %1414 = vmatpush3.bf16.msra.mxu1 %v1562_v16  ;;  %v1570_v3 = vld [vmem:[%s2173_s5 + $0x18] sm:$0xff]   ;;  %v1571_v4 = vld [vmem:[%s2173_s5 + $0x20] sm:$0xff]   ;;  %v1572_v5 = vld [vmem:[%s2173_s5 + $0x28] sm:$0xff]  }
  0x13   :  { %1368 = vmatpush3.bf16.msra.mxu0 %v1555_v7  ;;  %1415 = vmatprep.subr.bf16.mxu1 %v1563_v21  ;;  %v1573_v6 = vld [vmem:[%s2173_s5 + $0x30] sm:$0xff]   ;;  %v1806_v7 = vld [vmem:[%s2174_s2] ss:$0 sm:$0xff] }
  0x14   :  { %1369 = vmatprep.subr.bf16.mxu0 %v1556_v8 }
  0x16   :  { %1416 = vmatpush3.bf16.msra.mxu1 %v1563_v21 }
  0x17   :  { %1370 = vmatpush3.bf16.msra.mxu0 %v1556_v8  ;;  %1417 = vmatprep.subr.bf16.mxu1 %v1564_v24 }
  0x18   :  { %1371 = vmatprep.subr.bf16.mxu0 %v1557_v9 }
  0x1a   :  { %1418 = vmatpush3.bf16.msra.mxu1 %v1564_v24 }
  0x1b   :  { %1372 = vmatpush3.bf16.msra.mxu0 %v1557_v9  ;;  %1419 = vmatprep.subr.bf16.mxu1 %v1565_v62 }
  0x1c   :  { %1373 = vmatprep.subr.bf16.mxu0 %v1558_v13 }
  0x1e   :  { %1420 = vmatpush3.bf16.msra.mxu1 %v1565_v62 }
  0x1f   :  { %1374 = vmatpush3.bf16.msra.mxu0 %v1558_v13  ;;  %1421 = vmatprep.subr.bf16.mxu1 %v1566_v63 }
  0x20   :  { %1455 = vmatprep.subr.bf16.mxu0 %v1567_v0 }
  0x22   :  { %1376 = vmatmul.mubr.bf16.vlgmr.msra.gmra.mrb[0].mxu0 %v68_v19  ;;  %1422 = vmatpush3.bf16.msra.mxu1 %v1566_v63 }
  0x23   :  { %1379 = vmatprep.mubr.bf16.mxu0 %v69_v20  ;;  %1456 = vmatpush3.bf16.msra.mxu0 %v1567_v0 }
  0x24   :  { %1457 = vmatprep.subr.bf16.mxu0 %v1568_v1 }
  0x27   :  { %1458 = vmatpush3.bf16.msra.mxu0 %v1568_v1 }
  0x28   :  { %1459 = vmatprep.subr.bf16.mxu0 %v1569_v2 }
  0x2a   :  { %1380 = vmatmul.mubr.bf16.gmra.mrb[4].mxu0 %v70_v27 }
  0x2b   :  { %1383 = vmatprep.mubr.bf16.mxu0 %v71_v28  ;;  %1460 = vmatpush3.bf16.msra.mxu0 %v1569_v2 }
  0x2c   :  { %1461 = vmatprep.subr.bf16.mxu0 %v1570_v3 }
  0x2f   :  { %1462 = vmatpush3.bf16.msra.mxu0 %v1570_v3 }
  0x30   :  { %1463 = vmatprep.subr.bf16.mxu0 %v1571_v4 }
  0x32   :  { %1384 = vmatmul.mubr.bf16.gmra.mrb[8].mxu0 %v72_v33 }
  0x33   :  { %1387 = vmatprep.mubr.bf16.mxu0 %v73_v34  ;;  %1464 = vmatpush3.bf16.msra.mxu0 %v1571_v4 }
  0x34   :  { %1465 = vmatprep.subr.bf16.mxu0 %v1572_v5 }
  0x37   :  { %1466 = vmatpush3.bf16.msra.mxu0 %v1572_v5 }
  0x38   :  { %1467 = vmatprep.subr.bf16.mxu0 %v1573_v6 }
  0x3a   :  { %1388 = vmatmul.mubr.bf16.gmra.mrb[12].mxu0 %v74_v39 }
  0x3b   :  { %1391 = vmatprep.mubr.bf16.mxu0 %v75_v40  ;;  %1468 = vmatpush3.bf16.msra.mxu0 %v1573_v6 }
  0x42   :  { %1392 = vmatmul.mubr.bf16.gmra.mrb[16].mxu0 %v76_v45 }
  0x43   :  { %1395 = vmatprep.mubr.bf16.mxu0 %v77_v46 }
  0x4a   :  { %1396 = vmatmul.mubr.bf16.gmra.mrb[20].mxu0 %v78_v51 }
  0x4b   :  { %1399 = vmatprep.mubr.bf16.mxu0 %v79_v52 }
  0x52   :  { %1400 = vmatmul.mubr.bf16.gmra.mrb[24].mxu0 %v80_v57 }
  0x53   :  { %1403 = vmatprep.mubr.bf16.mxu0 %v81_v58 }
  0x5a   :  { %1404 = vmatmul.mubr.bf16.gmra.mrb[28].mxu0 %v82_v61 }
  0xf5   :  { %v1377_v8 = vpop.f32.mrb[0].mxu0 }
  0xf6   :  { %v197_v9 = vadd.f32 %v1377_v8, %v1806_v7  ;;  %v188_v10 = vpop.f32.mrb[1].mxu0 }
  0xf7   :  { %v189_v11 = vadd.f32 %v1806_v7, %v188_v10  ;;  %v1378_v12 = vpop.f32.mrb[2].mxu0 }
  0xf8   :  { %v200_v13 = vadd.f32 %v1378_v12, %v1806_v7  ;;  %v191_v14 = vpop.f32.mrb[3].mxu0  ;;  %v317_v16 = vmax.f32 %v197_v9, 0.0 }
  0xf9   :  { %v192_v15 = vadd.f32 %v1806_v7, %v191_v14  ;;  %v315_v18 = vmax.f32 %v189_v11, 0.0 }
  0xfa   :  { %v318_v17 = vmax.f32 %v200_v13, 0.0 }
  0xfb   :  { %v316_v19 = vmax.f32 %v192_v15, 0.0 }
  0xfc   :  { %v348_v20 = vpack.c.bf16 %v318_v17, %v317_v16 }
  0xfd   :  { %v1381_v21 = vpop.f32.mrb[4].mxu0  ;;  %v347_v22 = vpack.c.bf16 %v316_v19, %v315_v18 }
  0xfe   :  { %v213_v23 = vadd.f32 %v1381_v21, %v1806_v7  ;;  %v204_v24 = vpop.f32.mrb[5].mxu0 }
  0xff   :  { %v205_v25 = vadd.f32 %v1806_v7, %v204_v24  ;;  %v1382_v26 = vpop.f32.mrb[6].mxu0  ;;  %1423 = vmatprep.mubr.bf16.mxu1 %v347_v22 }
 0x100   :  { %v216_v27 = vadd.f32 %v1382_v26, %v1806_v7  ;;  %v207_v28 = vpop.f32.mrb[7].mxu0  ;;  %1424 = vmatmul.mubr.bf16.vlgmr.msra.gmra.mrb[0].mxu1 %v348_v20  ;;  %v321_v30 = vmax.f32 %v213_v23, 0.0 }
 0x101   :  { %v208_v29 = vadd.f32 %v1806_v7, %v207_v28  ;;  %v319_v32 = vmax.f32 %v205_v25, 0.0 }
 0x102   :  { %v322_v31 = vmax.f32 %v216_v27, 0.0 }
 0x103   :  { %v320_v33 = vmax.f32 %v208_v29, 0.0 }
 0x104   :  { %v350_v34 = vpack.c.bf16 %v322_v31, %v321_v30 }
 0x105   :  { %v349_v35 = vpack.c.bf16 %v320_v33, %v319_v32  ;;  %v1385_v36 = vpop.f32.mrb[8].mxu0 }
 0x106   :  { %v229_v37 = vadd.f32 %v1385_v36, %v1806_v7  ;;  %v220_v38 = vpop.f32.mrb[9].mxu0 }
 0x107   :  { %v221_v39 = vadd.f32 %v1806_v7, %v220_v38  ;;  %v1386_v40 = vpop.f32.mrb[10].mxu0  ;;  %1427 = vmatprep.mubr.bf16.mxu1 %v349_v35 }
 0x108   :  { %v232_v41 = vadd.f32 %v1386_v40, %v1806_v7  ;;  %v223_v42 = vpop.f32.mrb[11].mxu0  ;;  %1428 = vmatmul.mubr.bf16.gmra.mrb[4].mxu1 %v350_v34  ;;  %v325_v44 = vmax.f32 %v229_v37, 0.0 }
 0x109   :  { %v224_v43 = vadd.f32 %v1806_v7, %v223_v42  ;;  %v323_v46 = vmax.f32 %v221_v39, 0.0 }
 0x10a   :  { %v326_v45 = vmax.f32 %v232_v41, 0.0 }
 0x10b   :  { %v324_v47 = vmax.f32 %v224_v43, 0.0 }
 0x10c   :  { %v352_v48 = vpack.c.bf16 %v326_v45, %v325_v44 }
 0x10d   :  { %v351_v49 = vpack.c.bf16 %v324_v47, %v323_v46  ;;  %v1389_v50 = vpop.f32.mrb[12].mxu0 }
 0x10e   :  { %v245_v51 = vadd.f32 %v1389_v50, %v1806_v7  ;;  %v236_v52 = vpop.f32.mrb[13].mxu0 }
 0x10f   :  { %v237_v53 = vadd.f32 %v1806_v7, %v236_v52  ;;  %v1390_v54 = vpop.f32.mrb[14].mxu0  ;;  %1431 = vmatprep.mubr.bf16.mxu1 %v351_v49 }
 0x110   :  { %v248_v55 = vadd.f32 %v1390_v54, %v1806_v7  ;;  %v239_v56 = vpop.f32.mrb[15].mxu0  ;;  %1432 = vmatmul.mubr.bf16.gmra.mrb[8].mxu1 %v352_v48  ;;  %v329_v58 = vmax.f32 %v245_v51, 0.0 }
 0x111   :  { %v240_v57 = vadd.f32 %v1806_v7, %v239_v56  ;;  %v327_v60 = vmax.f32 %v237_v53, 0.0 }
 0x112   :  { %v330_v59 = vmax.f32 %v248_v55, 0.0 }
 0x113   :  { %v328_v61 = vmax.f32 %v240_v57, 0.0  ;;  %v1574_v57 = vld [vmem:[%s2173_s5 + $0x38] sm:$0xff]  }
 0x114   :  { %v354_v62 = vpack.c.bf16 %v330_v59, %v329_v58  ;;  %1469 = vmatprep.subr.bf16.mxu0 %v1574_v57  ;;  %v1575_v58 = vld [vmem:[%s2175_s7] sm:$0xff]   ;;  %v1577_v59 = vld [vmem:[%s2175_s7 + $0x10] sm:$0xff]  }
 0x115   :  { %v353_v63 = vpack.c.bf16 %v328_v61, %v327_v60  ;;  %v1393_v0 = vpop.f32.mrb[16].mxu0  ;;  %1470 = vmatpush3.bf16.msra.mxu0 %v1574_v57  ;;  %1503 = vmatprep.subr.bf16.mxu1 %v1575_v58  ;;  %v1578_v60 = vld [vmem:[%s2175_s7 + $0x18] sm:$0xff]   ;;  %v1579_v61 = vld [vmem:[%s2175_s7 + $0x20] sm:$0xff]  }
 0x116   :  { %v261_v1 = vadd.f32 %v1393_v0, %v1806_v7  ;;  %v252_v2 = vpop.f32.mrb[17].mxu0  ;;  %1504 = vmatpush3.bf16.msra.mxu1 %v1575_v58  ;;  %v1867_v0 = vld [vmem:[%s2176_s4] ss:$0 sm:$0xff] }
 0x117   :  { %v253_v3 = vadd.f32 %v1806_v7, %v252_v2  ;;  %v1394_v4 = vpop.f32.mrb[18].mxu0  ;;  %1435 = vmatprep.mubr.bf16.mxu1 %v353_v63  ;;  %v1581_v63 = vld [vmem:[%s2175_s7 + $0x30] sm:$0xff]  }
 0x118   :  { %v264_v5 = vadd.f32 %v1394_v4, %v1806_v7  ;;  %v255_v6 = vpop.f32.mrb[19].mxu0  ;;  %1436 = vmatmul.mubr.bf16.gmra.mrb[12].mxu1 %v354_v62  ;;  %v333_v9 = vmax.f32 %v261_v1, 0.0  ;;  %v1580_v62 = vld [vmem:[%s2175_s7 + $0x28] sm:$0xff]  }
 0x119   :  { %v256_v8 = vadd.f32 %v1806_v7, %v255_v6  ;;  %v331_v11 = vmax.f32 %v253_v3, 0.0 }
 0x11a   :  { %v334_v10 = vmax.f32 %v264_v5, 0.0 }
 0x11b   :  { %v332_v12 = vmax.f32 %v256_v8, 0.0 }
 0x11c   :  { %v356_v13 = vpack.c.bf16 %v334_v10, %v333_v9 }
 0x11d   :  { %v355_v14 = vpack.c.bf16 %v332_v12, %v331_v11  ;;  %v1397_v15 = vpop.f32.mrb[20].mxu0 }
 0x11e   :  { %v277_v16 = vadd.f32 %v1397_v15, %v1806_v7  ;;  %v268_v17 = vpop.f32.mrb[21].mxu0 }
 0x11f   :  { %v269_v18 = vadd.f32 %v1806_v7, %v268_v17  ;;  %v1398_v19 = vpop.f32.mrb[22].mxu0  ;;  %1439 = vmatprep.mubr.bf16.mxu1 %v355_v14 }
 0x120   :  { %v280_v20 = vadd.f32 %v1398_v19, %v1806_v7  ;;  %v271_v21 = vpop.f32.mrb[23].mxu0  ;;  %1440 = vmatmul.mubr.bf16.gmra.mrb[16].mxu1 %v356_v13  ;;  %v337_v23 = vmax.f32 %v277_v16, 0.0 }
 0x121   :  { %v272_v22 = vadd.f32 %v1806_v7, %v271_v21  ;;  %v335_v25 = vmax.f32 %v269_v18, 0.0 }
 0x122   :  { %v338_v24 = vmax.f32 %v280_v20, 0.0 }
 0x123   :  { %v336_v26 = vmax.f32 %v272_v22, 0.0 }
 0x124   :  { %v358_v27 = vpack.c.bf16 %v338_v24, %v337_v23 }
 0x125   :  { %v357_v28 = vpack.c.bf16 %v336_v26, %v335_v25  ;;  %v1401_v29 = vpop.f32.mrb[24].mxu0 }
 0x126   :  { %v293_v30 = vadd.f32 %v1401_v29, %v1806_v7  ;;  %v284_v31 = vpop.f32.mrb[25].mxu0 }
 0x127   :  { %v285_v32 = vadd.f32 %v1806_v7, %v284_v31  ;;  %v1402_v33 = vpop.f32.mrb[26].mxu0  ;;  %1443 = vmatprep.mubr.bf16.mxu1 %v357_v28 }
 0x128   :  { %v296_v34 = vadd.f32 %v1402_v33, %v1806_v7  ;;  %v287_v35 = vpop.f32.mrb[27].mxu0  ;;  %1444 = vmatmul.mubr.bf16.gmra.mrb[20].mxu1 %v358_v27  ;;  %v341_v37 = vmax.f32 %v293_v30, 0.0 }
 0x129   :  { %v288_v36 = vadd.f32 %v1806_v7, %v287_v35  ;;  %v339_v39 = vmax.f32 %v285_v32, 0.0 }
 0x12a   :  { %v342_v38 = vmax.f32 %v296_v34, 0.0 }
 0x12b   :  { %v340_v40 = vmax.f32 %v288_v36, 0.0 }
 0x12c   :  { %v360_v41 = vpack.c.bf16 %v342_v38, %v341_v37 }
 0x12d   :  { %v359_v42 = vpack.c.bf16 %v340_v40, %v339_v39  ;;  %v1405_v43 = vpop.f32.mrb[28].mxu0 }
 0x12e   :  { %v309_v44 = vadd.f32 %v1405_v43, %v1806_v7  ;;  %v300_v45 = vpop.f32.mrb[29].mxu0 }
 0x12f   :  { %v301_v46 = vadd.f32 %v1806_v7, %v300_v45  ;;  %v1406_v47 = vpop.f32.mrb[30].mxu0  ;;  %1447 = vmatprep.mubr.bf16.mxu1 %v359_v42 }
 0x130   :  { %v312_v48 = vadd.f32 %v1406_v47, %v1806_v7  ;;  %v303_v49 = vpop.f32.mrb[31].mxu0  ;;  %1448 = vmatmul.mubr.bf16.gmra.mrb[24].mxu1 %v360_v41  ;;  %v345_v51 = vmax.f32 %v309_v44, 0.0 }
 0x131   :  { %v304_v50 = vadd.f32 %v1806_v7, %v303_v49  ;;  %v343_v53 = vmax.f32 %v301_v46, 0.0  ;;  %v1576_v7 = vld [vmem:[%s2175_s7 + $0x8] sm:$0xff]  }
 0x132   :  { %v346_v52 = vmax.f32 %v312_v48, 0.0  ;;  %1505 = vmatprep.subr.bf16.mxu1 %v1576_v7 }
 0x133   :  { %v344_v54 = vmax.f32 %v304_v50, 0.0  ;;  %1506 = vmatpush3.bf16.msra.mxu1 %v1576_v7 }
 0x134   :  { %v362_v55 = vpack.c.bf16 %v346_v52, %v345_v51  ;;  %1507 = vmatprep.subr.bf16.mxu1 %v1577_v59 }
 0x135   :  { %v361_v56 = vpack.c.bf16 %v344_v54, %v343_v53 }
 0x137   :  { %1451 = vmatprep.mubr.bf16.mxu1 %v361_v56  ;;  %1508 = vmatpush3.bf16.msra.mxu1 %v1577_v59 }
 0x138   :  { %1452 = vmatmul.mubr.bf16.gmra.mrb[28].mxu1 %v362_v55  ;;  %1509 = vmatprep.subr.bf16.mxu1 %v1578_v60 }
 0x13b   :  { %1510 = vmatpush3.bf16.msra.mxu1 %v1578_v60 }
 0x13c   :  { %1511 = vmatprep.subr.bf16.mxu1 %v1579_v61 }
 0x13f   :  { %1512 = vmatpush3.bf16.msra.mxu1 %v1579_v61 }
 0x140   :  { %1513 = vmatprep.subr.bf16.mxu1 %v1580_v62 }
 0x143   :  { %1514 = vmatpush3.bf16.msra.mxu1 %v1580_v62 }
 0x144   :  { %1515 = vmatprep.subr.bf16.mxu1 %v1581_v63 }
 0x147   :  { %1516 = vmatpush3.bf16.msra.mxu1 %v1581_v63 }
 0x1d3   :  { %v1425_v1 = vpop.f32.mrb[0].mxu1 }
 0x1d4   :  { %v477_v2 = vadd.f32 %v1425_v1, %v1867_v0  ;;  %v468_v3 = vpop.f32.mrb[1].mxu1 }
 0x1d5   :  { %v469_v4 = vadd.f32 %v1867_v0, %v468_v3  ;;  %v1426_v5 = vpop.f32.mrb[2].mxu1 }
 0x1d6   :  { %v597_v6 = vmax.f32 %v477_v2, 0.0  ;;  %v480_v8 = vadd.f32 %v1426_v5, %v1867_v0  ;;  %v471_v9 = vpop.f32.mrb[3].mxu1 }
 0x1d7   :  { %v595_v10 = vmax.f32 %v469_v4, 0.0  ;;  %v472_v11 = vadd.f32 %v1867_v0, %v471_v9 }
 0x1d8   :  { %629 = vst [vmem:[%s2177_s10 + $0x10] sm:$0xff] %v597_v6  ;;  %v598_v12 = vmax.f32 %v480_v8, 0.0 }
 0x1d9   :  { %627 = vst [vmem:[%s2177_s10] sm:$0xff] %v595_v10  ;;  %v596_v13 = vmax.f32 %v472_v11, 0.0 }
 0x1da   :  { %630 = vst [vmem:[%s2177_s10 + $0x18] sm:$0xff] %v598_v12  ;;  %v660_v14 = vpack.c.bf16 %v598_v12, %v597_v6 }
 0x1db   :  { %628 = vst [vmem:[%s2177_s10 + $0x8] sm:$0xff] %v596_v13  ;;  %v659_v15 = vpack.c.bf16 %v596_v13, %v595_v10  ;;  %v1429_v16 = vpop.f32.mrb[4].mxu1 }
 0x1dc   :  { %v493_v17 = vadd.f32 %v1429_v16, %v1867_v0  ;;  %v484_v18 = vpop.f32.mrb[5].mxu1 }
 0x1dd   :  { %v485_v19 = vadd.f32 %v1867_v0, %v484_v18  ;;  %v1430_v20 = vpop.f32.mrb[6].mxu1  ;;  %1471 = vmatprep.mubr.bf16.mxu0 %v659_v15 }
 0x1de   :  { %v601_v21 = vmax.f32 %v493_v17, 0.0  ;;  %v496_v22 = vadd.f32 %v1430_v20, %v1867_v0  ;;  %v487_v23 = vpop.f32.mrb[7].mxu1  ;;  %1472 = vmatmul.mubr.bf16.vlgmr.msra.gmra.mrb[32].mxu0 %v660_v14 }
 0x1df   :  { %v599_v24 = vmax.f32 %v485_v19, 0.0  ;;  %v488_v25 = vadd.f32 %v1867_v0, %v487_v23 }
 0x1e0   :  { %633 = vst [vmem:[%s2177_s10 + $0x30] sm:$0xff] %v601_v21  ;;  %v602_v26 = vmax.f32 %v496_v22, 0.0 }
 0x1e1   :  { %631 = vst [vmem:[%s2177_s10 + $0x20] sm:$0xff] %v599_v24  ;;  %v600_v27 = vmax.f32 %v488_v25, 0.0 }
 0x1e2   :  { %634 = vst [vmem:[%s2177_s10 + $0x38] sm:$0xff] %v602_v26  ;;  %v662_v28 = vpack.c.bf16 %v602_v26, %v601_v21 }
 0x1e3   :  { %632 = vst [vmem:[%s2177_s10 + $0x28] sm:$0xff] %v600_v27  ;;  %v661_v29 = vpack.c.bf16 %v600_v27, %v599_v24  ;;  %v1433_v30 = vpop.f32.mrb[8].mxu1 }
 0x1e4   :  { %v509_v31 = vadd.f32 %v1433_v30, %v1867_v0  ;;  %v500_v32 = vpop.f32.mrb[9].mxu1 }
 0x1e5   :  { %v501_v33 = vadd.f32 %v1867_v0, %v500_v32  ;;  %v1434_v34 = vpop.f32.mrb[10].mxu1  ;;  %1475 = vmatprep.mubr.bf16.mxu0 %v661_v29 }
 0x1e6   :  { %v605_v35 = vmax.f32 %v509_v31, 0.0  ;;  %v512_v36 = vadd.f32 %v1434_v34, %v1867_v0  ;;  %v503_v37 = vpop.f32.mrb[11].mxu1  ;;  %1476 = vmatmul.mubr.bf16.gmra.mrb[36].mxu0 %v662_v28 }
 0x1e7   :  { %v603_v38 = vmax.f32 %v501_v33, 0.0  ;;  %v504_v39 = vadd.f32 %v1867_v0, %v503_v37 }
 0x1e8   :  { %637 = vst [vmem:[%s2177_s10 + $0x50] sm:$0xff] %v605_v35  ;;  %v606_v40 = vmax.f32 %v512_v36, 0.0 }
 0x1e9   :  { %635 = vst [vmem:[%s2177_s10 + $0x40] sm:$0xff] %v603_v38  ;;  %v604_v41 = vmax.f32 %v504_v39, 0.0 }
 0x1ea   :  { %638 = vst [vmem:[%s2177_s10 + $0x58] sm:$0xff] %v606_v40  ;;  %v664_v42 = vpack.c.bf16 %v606_v40, %v605_v35 }
 0x1eb   :  { %636 = vst [vmem:[%s2177_s10 + $0x48] sm:$0xff] %v604_v41  ;;  %v663_v43 = vpack.c.bf16 %v604_v41, %v603_v38  ;;  %v1437_v44 = vpop.f32.mrb[12].mxu1 }
 0x1ec   :  { %v525_v45 = vadd.f32 %v1437_v44, %v1867_v0  ;;  %v516_v46 = vpop.f32.mrb[13].mxu1 }
 0x1ed   :  { %v517_v47 = vadd.f32 %v1867_v0, %v516_v46  ;;  %v1438_v48 = vpop.f32.mrb[14].mxu1  ;;  %1479 = vmatprep.mubr.bf16.mxu0 %v663_v43 }
 0x1ee   :  { %v609_v49 = vmax.f32 %v525_v45, 0.0  ;;  %v528_v50 = vadd.f32 %v1438_v48, %v1867_v0  ;;  %v519_v51 = vpop.f32.mrb[15].mxu1  ;;  %1480 = vmatmul.mubr.bf16.gmra.mrb[40].mxu0 %v664_v42 }
 0x1ef   :  { %v607_v52 = vmax.f32 %v517_v47, 0.0  ;;  %v520_v53 = vadd.f32 %v1867_v0, %v519_v51  ;;  %v2003_v51 = vld [vmem:[%s2178_s6] ss:$0 sm:$0xff] }
 0x1f0   :  { %641 = vst [vmem:[%s2177_s10 + $0x70] sm:$0xff] %v609_v49  ;;  %v610_v54 = vmax.f32 %v528_v50, 0.0  ;;  %v1582_v50 = vld [vmem:[%s2175_s7 + $0x38] sm:$0xff]  }
 0x1f1   :  { %639 = vst [vmem:[%s2177_s10 + $0x60] sm:$0xff] %v607_v52  ;;  %v608_v55 = vmax.f32 %v520_v53, 0.0  ;;  %1517 = vmatprep.subr.bf16.mxu1 %v1582_v50 }
 0x1f2   :  { %642 = vst [vmem:[%s2177_s10 + $0x78] sm:$0xff] %v610_v54  ;;  %v666_v56 = vpack.c.bf16 %v610_v54, %v609_v49  ;;  %1518 = vmatpush3.bf16.msra.mxu1 %v1582_v50 }
 0x1f3   :  { %640 = vst [vmem:[%s2177_s10 + $0x68] sm:$0xff] %v608_v55  ;;  %v665_v57 = vpack.c.bf16 %v608_v55, %v607_v52  ;;  %v1441_v58 = vpop.f32.mrb[16].mxu1 }
 0x1f4   :  { %v541_v7 = vadd.f32 %v1441_v58, %v1867_v0  ;;  %v532_v59 = vpop.f32.mrb[17].mxu1 }
 0x1f5   :  { %v533_v60 = vadd.f32 %v1867_v0, %v532_v59  ;;  %v1442_v61 = vpop.f32.mrb[18].mxu1  ;;  %1483 = vmatprep.mubr.bf16.mxu0 %v665_v57 }
 0x1f6   :  { %v613_v62 = vmax.f32 %v541_v7, 0.0  ;;  %v544_v63 = vadd.f32 %v1442_v61, %v1867_v0  ;;  %v535_v1 = vpop.f32.mrb[19].mxu1  ;;  %1484 = vmatmul.mubr.bf16.gmra.mrb[44].mxu0 %v666_v56 }
 0x1f7   :  { %v611_v2 = vmax.f32 %v533_v60, 0.0  ;;  %v536_v3 = vadd.f32 %v1867_v0, %v535_v1 }
 0x1f8   :  { %645 = vst [vmem:[%s2177_s10 + $0x90] sm:$0xff] %v613_v62  ;;  %v614_v4 = vmax.f32 %v544_v63, 0.0 }
 0x1f9   :  { %643 = vst [vmem:[%s2177_s10 + $0x80] sm:$0xff] %v611_v2  ;;  %v612_v5 = vmax.f32 %v536_v3, 0.0 }
 0x1fa   :  { %646 = vst [vmem:[%s2177_s10 + $0x98] sm:$0xff] %v614_v4  ;;  %v668_v6 = vpack.c.bf16 %v614_v4, %v613_v62 }
 0x1fb   :  { %644 = vst [vmem:[%s2177_s10 + $0x88] sm:$0xff] %v612_v5  ;;  %v667_v8 = vpack.c.bf16 %v612_v5, %v611_v2  ;;  %v1445_v9 = vpop.f32.mrb[20].mxu1 }
 0x1fc   :  { %v557_v10 = vadd.f32 %v1445_v9, %v1867_v0  ;;  %v548_v11 = vpop.f32.mrb[21].mxu1 }
 0x1fd   :  { %v549_v12 = vadd.f32 %v1867_v0, %v548_v11  ;;  %v1446_v13 = vpop.f32.mrb[22].mxu1  ;;  %1487 = vmatprep.mubr.bf16.mxu0 %v667_v8 }
 0x1fe   :  { %v617_v14 = vmax.f32 %v557_v10, 0.0  ;;  %v560_v15 = vadd.f32 %v1446_v13, %v1867_v0  ;;  %v551_v16 = vpop.f32.mrb[23].mxu1  ;;  %1488 = vmatmul.mubr.bf16.gmra.mrb[48].mxu0 %v668_v6 }
 0x1ff   :  { %v615_v17 = vmax.f32 %v549_v12, 0.0  ;;  %v552_v18 = vadd.f32 %v1867_v0, %v551_v16 }
 0x200   :  { %649 = vst [vmem:[%s2177_s10 + $0xb0] sm:$0xff] %v617_v14  ;;  %v618_v19 = vmax.f32 %v560_v15, 0.0 }
 0x201   :  { %647 = vst [vmem:[%s2177_s10 + $0xa0] sm:$0xff] %v615_v17  ;;  %v616_v20 = vmax.f32 %v552_v18, 0.0 }
 0x202   :  { %650 = vst [vmem:[%s2177_s10 + $0xb8] sm:$0xff] %v618_v19  ;;  %v670_v21 = vpack.c.bf16 %v618_v19, %v617_v14 }
 0x203   :  { %648 = vst [vmem:[%s2177_s10 + $0xa8] sm:$0xff] %v616_v20  ;;  %v669_v22 = vpack.c.bf16 %v616_v20, %v615_v17  ;;  %v1449_v23 = vpop.f32.mrb[24].mxu1 }
 0x204   :  { %v573_v24 = vadd.f32 %v1449_v23, %v1867_v0  ;;  %v564_v25 = vpop.f32.mrb[25].mxu1 }
 0x205   :  { %v565_v26 = vadd.f32 %v1867_v0, %v564_v25  ;;  %v1450_v27 = vpop.f32.mrb[26].mxu1  ;;  %1491 = vmatprep.mubr.bf16.mxu0 %v669_v22 }
 0x206   :  { %v621_v28 = vmax.f32 %v573_v24, 0.0  ;;  %v576_v29 = vadd.f32 %v1450_v27, %v1867_v0  ;;  %v567_v30 = vpop.f32.mrb[27].mxu1  ;;  %1492 = vmatmul.mubr.bf16.gmra.mrb[52].mxu0 %v670_v21 }
 0x207   :  { %v619_v31 = vmax.f32 %v565_v26, 0.0  ;;  %v568_v32 = vadd.f32 %v1867_v0, %v567_v30 }
 0x208   :  { %653 = vst [vmem:[%s2177_s10 + $0xd0] sm:$0xff] %v621_v28  ;;  %v622_v33 = vmax.f32 %v576_v29, 0.0 }
 0x209   :  { %651 = vst [vmem:[%s2177_s10 + $0xc0] sm:$0xff] %v619_v31  ;;  %v620_v34 = vmax.f32 %v568_v32, 0.0 }
 0x20a   :  { %654 = vst [vmem:[%s2177_s10 + $0xd8] sm:$0xff] %v622_v33  ;;  %v672_v35 = vpack.c.bf16 %v622_v33, %v621_v28 }
 0x20b   :  { %652 = vst [vmem:[%s2177_s10 + $0xc8] sm:$0xff] %v620_v34  ;;  %v671_v36 = vpack.c.bf16 %v620_v34, %v619_v31  ;;  %v1453_v37 = vpop.f32.mrb[28].mxu1 }
 0x20c   :  { %v589_v38 = vadd.f32 %v1453_v37, %v1867_v0  ;;  %v580_v39 = vpop.f32.mrb[29].mxu1 }
 0x20d   :  { %v581_v40 = vadd.f32 %v1867_v0, %v580_v39  ;;  %v1454_v41 = vpop.f32.mrb[30].mxu1  ;;  %1495 = vmatprep.mubr.bf16.mxu0 %v671_v36 }
 0x20e   :  { %v625_v42 = vmax.f32 %v589_v38, 0.0  ;;  %v592_v43 = vadd.f32 %v1454_v41, %v1867_v0  ;;  %v583_v44 = vpop.f32.mrb[31].mxu1  ;;  %1496 = vmatmul.mubr.bf16.gmra.mrb[56].mxu0 %v672_v35 }
 0x20f   :  { %v623_v45 = vmax.f32 %v581_v40, 0.0  ;;  %v584_v46 = vadd.f32 %v1867_v0, %v583_v44 }
 0x210   :  { %657 = vst [vmem:[%s2177_s10 + $0xf0] sm:$0xff] %v625_v42  ;;  %v626_v47 = vmax.f32 %v592_v43, 0.0 }
 0x211   :  { %655 = vst [vmem:[%s2177_s10 + $0xe0] sm:$0xff] %v623_v45  ;;  %v624_v48 = vmax.f32 %v584_v46, 0.0 }
 0x212   :  { %658 = vst [vmem:[%s2177_s10 + $0xf8] sm:$0xff] %v626_v47  ;;  %v674_v49 = vpack.c.bf16 %v626_v47, %v625_v42 }
 0x213   :  { %656 = vst [vmem:[%s2177_s10 + $0xe8] sm:$0xff] %v624_v48  ;;  %v673_v0 = vpack.c.bf16 %v624_v48, %v623_v45 }
 0x215   :  { %1499 = vmatprep.mubr.bf16.mxu0 %v673_v0 }
 0x216   :  { %1500 = vmatmul.mubr.bf16.gmra.mrb[60].mxu0 %v674_v49 }
 0x2b1   :  { %v1473_v52 = vpop.f32.mrb[32].mxu0 }
 0x2b2   :  { %v789_v53 = vadd.f32 %v1473_v52, %v2003_v51  ;;  %v780_v54 = vpop.f32.mrb[33].mxu0 }
 0x2b3   :  { %v781_v55 = vadd.f32 %v2003_v51, %v780_v54  ;;  %v1474_v56 = vpop.f32.mrb[34].mxu0 }
 0x2b4   :  { %v792_v57 = vadd.f32 %v1474_v56, %v2003_v51  ;;  %v783_v58 = vpop.f32.mrb[35].mxu0  ;;  %v909_v59 = vmax.f32 %v789_v53, 0.0 }
 0x2b5   :  { %v784_v7 = vadd.f32 %v2003_v51, %v783_v58  ;;  %v907_v61 = vmax.f32 %v781_v55, 0.0 }
 0x2b6   :  { %v910_v60 = vmax.f32 %v792_v57, 0.0 }
 0x2b7   :  { %v908_v62 = vmax.f32 %v784_v7, 0.0 }
 0x2b8   :  { %v940_v63 = vpack.c.bf16 %v910_v60, %v909_v59 }
 0x2b9   :  { %v939_v1 = vpack.c.bf16 %v908_v62, %v907_v61  ;;  %v1477_v2 = vpop.f32.mrb[36].mxu0 }
 0x2ba   :  { %v805_v3 = vadd.f32 %v1477_v2, %v2003_v51  ;;  %v796_v4 = vpop.f32.mrb[37].mxu0 }
 0x2bb   :  { %v797_v5 = vadd.f32 %v2003_v51, %v796_v4  ;;  %v1478_v6 = vpop.f32.mrb[38].mxu0  ;;  %1519 = vmatprep.mubr.bf16.mxu1 %v939_v1 }
 0x2bc   :  { %v808_v8 = vadd.f32 %v1478_v6, %v2003_v51  ;;  %v799_v9 = vpop.f32.mrb[39].mxu0  ;;  %1520 = vmatmul.mubr.bf16.vlgmr.msra.gmra.mrb[32].mxu1 %v940_v63  ;;  %v913_v11 = vmax.f32 %v805_v3, 0.0 }
 0x2bd   :  { %v800_v10 = vadd.f32 %v2003_v51, %v799_v9  ;;  %v911_v13 = vmax.f32 %v797_v5, 0.0 }
 0x2be   :  { %v914_v12 = vmax.f32 %v808_v8, 0.0 }
 0x2bf   :  { %v912_v14 = vmax.f32 %v800_v10, 0.0 }
 0x2c0   :  { %v942_v15 = vpack.c.bf16 %v914_v12, %v913_v11 }
 0x2c1   :  { %v941_v16 = vpack.c.bf16 %v912_v14, %v911_v13  ;;  %v1481_v17 = vpop.f32.mrb[40].mxu0 }
 0x2c2   :  { %v821_v18 = vadd.f32 %v1481_v17, %v2003_v51  ;;  %v812_v19 = vpop.f32.mrb[41].mxu0 }
 0x2c3   :  { %v813_v20 = vadd.f32 %v2003_v51, %v812_v19  ;;  %v1482_v21 = vpop.f32.mrb[42].mxu0  ;;  %1523 = vmatprep.mubr.bf16.mxu1 %v941_v16 }
 0x2c4   :  { %v824_v22 = vadd.f32 %v1482_v21, %v2003_v51  ;;  %v815_v23 = vpop.f32.mrb[43].mxu0  ;;  %1524 = vmatmul.mubr.bf16.gmra.mrb[36].mxu1 %v942_v15  ;;  %v917_v25 = vmax.f32 %v821_v18, 0.0 }
 0x2c5   :  { %v816_v24 = vadd.f32 %v2003_v51, %v815_v23  ;;  %v915_v27 = vmax.f32 %v813_v20, 0.0 }
 0x2c6   :  { %v918_v26 = vmax.f32 %v824_v22, 0.0 }
 0x2c7   :  { %v916_v28 = vmax.f32 %v816_v24, 0.0 }
 0x2c8   :  { %v944_v29 = vpack.c.bf16 %v918_v26, %v917_v25 }
 0x2c9   :  { %v943_v30 = vpack.c.bf16 %v916_v28, %v915_v27  ;;  %v1485_v31 = vpop.f32.mrb[44].mxu0 }
 0x2ca   :  { %v837_v32 = vadd.f32 %v1485_v31, %v2003_v51  ;;  %v828_v33 = vpop.f32.mrb[45].mxu0 }
 0x2cb   :  { %v829_v34 = vadd.f32 %v2003_v51, %v828_v33  ;;  %v1486_v35 = vpop.f32.mrb[46].mxu0  ;;  %1527 = vmatprep.mubr.bf16.mxu1 %v943_v30 }
 0x2cc   :  { %v840_v36 = vadd.f32 %v1486_v35, %v2003_v51  ;;  %v831_v37 = vpop.f32.mrb[47].mxu0  ;;  %1528 = vmatmul.mubr.bf16.gmra.mrb[40].mxu1 %v944_v29  ;;  %v921_v39 = vmax.f32 %v837_v32, 0.0 }
 0x2cd   :  { %v832_v38 = vadd.f32 %v2003_v51, %v831_v37  ;;  %v919_v41 = vmax.f32 %v829_v34, 0.0 }
 0x2ce   :  { %v922_v40 = vmax.f32 %v840_v36, 0.0 }
 0x2cf   :  { %v920_v42 = vmax.f32 %v832_v38, 0.0  ;;  %v2040_v38 = vld [vmem:[%s2179_s8] ss:$0 sm:$0xff] }
 0x2d0   :  { %v946_v43 = vpack.c.bf16 %v922_v40, %v921_v39 }
 0x2d1   :  { %v945_v44 = vpack.c.bf16 %v920_v42, %v919_v41  ;;  %v1489_v45 = vpop.f32.mrb[48].mxu0 }
 0x2d2   :  { %v853_v46 = vadd.f32 %v1489_v45, %v2003_v51  ;;  %v844_v47 = vpop.f32.mrb[49].mxu0 }
 0x2d3   :  { %v845_v48 = vadd.f32 %v2003_v51, %v844_v47  ;;  %v1490_v49 = vpop.f32.mrb[50].mxu0  ;;  %1531 = vmatprep.mubr.bf16.mxu1 %v945_v44 }
 0x2d4   :  { %v856_v0 = vadd.f32 %v1490_v49, %v2003_v51  ;;  %v847_v50 = vpop.f32.mrb[51].mxu0  ;;  %1532 = vmatmul.mubr.bf16.gmra.mrb[44].mxu1 %v946_v43  ;;  %v925_v53 = vmax.f32 %v853_v46, 0.0 }
 0x2d5   :  { %v848_v52 = vadd.f32 %v2003_v51, %v847_v50  ;;  %v923_v55 = vmax.f32 %v845_v48, 0.0 }
 0x2d6   :  { %v926_v54 = vmax.f32 %v856_v0, 0.0 }
 0x2d7   :  { %v924_v56 = vmax.f32 %v848_v52, 0.0 }
 0x2d8   :  { %v948_v57 = vpack.c.bf16 %v926_v54, %v925_v53 }
 0x2d9   :  { %v947_v58 = vpack.c.bf16 %v924_v56, %v923_v55  ;;  %v1493_v7 = vpop.f32.mrb[52].mxu0 }
 0x2da   :  { %v869_v59 = vadd.f32 %v1493_v7, %v2003_v51  ;;  %v860_v60 = vpop.f32.mrb[53].mxu0 }
 0x2db   :  { %v861_v61 = vadd.f32 %v2003_v51, %v860_v60  ;;  %v1494_v62 = vpop.f32.mrb[54].mxu0  ;;  %1535 = vmatprep.mubr.bf16.mxu1 %v947_v58 }
 0x2dc   :  { %v872_v63 = vadd.f32 %v1494_v62, %v2003_v51  ;;  %v863_v1 = vpop.f32.mrb[55].mxu0  ;;  %1536 = vmatmul.mubr.bf16.gmra.mrb[48].mxu1 %v948_v57  ;;  %v929_v3 = vmax.f32 %v869_v59, 0.0 }
 0x2dd   :  { %v864_v2 = vadd.f32 %v2003_v51, %v863_v1  ;;  %v927_v5 = vmax.f32 %v861_v61, 0.0 }
 0x2de   :  { %v930_v4 = vmax.f32 %v872_v63, 0.0 }
 0x2df   :  { %v928_v6 = vmax.f32 %v864_v2, 0.0 }
 0x2e0   :  { %v950_v8 = vpack.c.bf16 %v930_v4, %v929_v3 }
 0x2e1   :  { %v949_v9 = vpack.c.bf16 %v928_v6, %v927_v5  ;;  %v1497_v10 = vpop.f32.mrb[56].mxu0 }
 0x2e2   :  { %v885_v11 = vadd.f32 %v1497_v10, %v2003_v51  ;;  %v876_v12 = vpop.f32.mrb[57].mxu0 }
 0x2e3   :  { %v877_v13 = vadd.f32 %v2003_v51, %v876_v12  ;;  %v1498_v14 = vpop.f32.mrb[58].mxu0  ;;  %1539 = vmatprep.mubr.bf16.mxu1 %v949_v9 }
 0x2e4   :  { %v888_v15 = vadd.f32 %v1498_v14, %v2003_v51  ;;  %v879_v16 = vpop.f32.mrb[59].mxu0  ;;  %1540 = vmatmul.mubr.bf16.gmra.mrb[52].mxu1 %v950_v8  ;;  %v933_v18 = vmax.f32 %v885_v11, 0.0 }
 0x2e5   :  { %v880_v17 = vadd.f32 %v2003_v51, %v879_v16  ;;  %v931_v20 = vmax.f32 %v877_v13, 0.0 }
 0x2e6   :  { %v934_v19 = vmax.f32 %v888_v15, 0.0 }
 0x2e7   :  { %v932_v21 = vmax.f32 %v880_v17, 0.0 }
 0x2e8   :  { %v952_v22 = vpack.c.bf16 %v934_v19, %v933_v18 }
 0x2e9   :  { %v951_v23 = vpack.c.bf16 %v932_v21, %v931_v20  ;;  %v1501_v24 = vpop.f32.mrb[60].mxu0 }
 0x2ea   :  { %v901_v25 = vadd.f32 %v1501_v24, %v2003_v51  ;;  %v892_v26 = vpop.f32.mrb[61].mxu0 }
 0x2eb   :  { %v893_v27 = vadd.f32 %v2003_v51, %v892_v26  ;;  %v1502_v28 = vpop.f32.mrb[62].mxu0  ;;  %1543 = vmatprep.mubr.bf16.mxu1 %v951_v23 }
 0x2ec   :  { %v904_v29 = vadd.f32 %v1502_v28, %v2003_v51  ;;  %v895_v30 = vpop.f32.mrb[63].mxu0  ;;  %1544 = vmatmul.mubr.bf16.gmra.mrb[56].mxu1 %v952_v22  ;;  %v937_v32 = vmax.f32 %v901_v25, 0.0 }
 0x2ed   :  { %v896_v31 = vadd.f32 %v2003_v51, %v895_v30  ;;  %v935_v34 = vmax.f32 %v893_v27, 0.0 }
 0x2ee   :  { %v938_v33 = vmax.f32 %v904_v29, 0.0 }
 0x2ef   :  { %v936_v35 = vmax.f32 %v896_v31, 0.0 }
 0x2f0   :  { %v954_v36 = vpack.c.bf16 %v938_v33, %v937_v32 }
 0x2f1   :  { %v953_v37 = vpack.c.bf16 %v936_v35, %v935_v34 }
 0x2f3   :  { %1547 = vmatprep.mubr.bf16.mxu1 %v953_v37 }
 0x2f4   :  { %1548 = vmatmul.mubr.bf16.gmra.mrb[60].mxu1 %v954_v36 }
 0x38f   :  { %v1521_v39 = vpop.f32.mrb[32].mxu1 }
 0x390   :  { %v1069_v40 = vadd.f32 %v1521_v39, %v2040_v38  ;;  %v1060_v41 = vpop.f32.mrb[33].mxu1 }
 0x391   :  { %v1061_v42 = vadd.f32 %v2040_v38, %v1060_v41  ;;  %v1522_v51 = vpop.f32.mrb[34].mxu1 }
 0x392   :  { %1189 = vst [vmem:[%s2180_s9 + $0x10] sm:$0xff] %v1069_v40  ;;  %v1072_v43 = vadd.f32 %v1522_v51, %v2040_v38  ;;  %v1063_v44 = vpop.f32.mrb[35].mxu1 }
 0x393   :  { %1187 = vst [vmem:[%s2180_s9] sm:$0xff] %v1061_v42  ;;  %v1064_v45 = vadd.f32 %v2040_v38, %v1063_v44 }
 0x394   :  { %1190 = vst [vmem:[%s2180_s9 + $0x18] sm:$0xff] %v1072_v43 }
 0x395   :  { %1188 = vst [vmem:[%s2180_s9 + $0x8] sm:$0xff] %v1064_v45 }
 0x397   :  { %v1525_v46 = vpop.f32.mrb[36].mxu1 }
 0x398   :  { %v1085_v47 = vadd.f32 %v1525_v46, %v2040_v38  ;;  %v1076_v48 = vpop.f32.mrb[37].mxu1 }
 0x399   :  { %v1077_v49 = vadd.f32 %v2040_v38, %v1076_v48  ;;  %v1526_v0 = vpop.f32.mrb[38].mxu1 }
 0x39a   :  { %1193 = vst [vmem:[%s2180_s9 + $0x30] sm:$0xff] %v1085_v47  ;;  %v1088_v50 = vadd.f32 %v1526_v0, %v2040_v38  ;;  %v1079_v52 = vpop.f32.mrb[39].mxu1 }
 0x39b   :  { %1191 = vst [vmem:[%s2180_s9 + $0x20] sm:$0xff] %v1077_v49  ;;  %v1080_v53 = vadd.f32 %v2040_v38, %v1079_v52 }
 0x39c   :  { %1194 = vst [vmem:[%s2180_s9 + $0x38] sm:$0xff] %v1088_v50 }
 0x39d   :  { %1192 = vst [vmem:[%s2180_s9 + $0x28] sm:$0xff] %v1080_v53 }
 0x39f   :  { %v1529_v54 = vpop.f32.mrb[40].mxu1 }
 0x3a0   :  { %v1101_v55 = vadd.f32 %v1529_v54, %v2040_v38  ;;  %v1092_v56 = vpop.f32.mrb[41].mxu1 }
 0x3a1   :  { %v1093_v57 = vadd.f32 %v2040_v38, %v1092_v56  ;;  %v1530_v58 = vpop.f32.mrb[42].mxu1 }
 0x3a2   :  { %1197 = vst [vmem:[%s2180_s9 + $0x50] sm:$0xff] %v1101_v55  ;;  %v1104_v7 = vadd.f32 %v1530_v58, %v2040_v38  ;;  %v1095_v59 = vpop.f32.mrb[43].mxu1 }
 0x3a3   :  { %1195 = vst [vmem:[%s2180_s9 + $0x40] sm:$0xff] %v1093_v57  ;;  %v1096_v60 = vadd.f32 %v2040_v38, %v1095_v59 }
 0x3a4   :  { %1198 = vst [vmem:[%s2180_s9 + $0x58] sm:$0xff] %v1104_v7 }
 0x3a5   :  { %1196 = vst [vmem:[%s2180_s9 + $0x48] sm:$0xff] %v1096_v60 }
 0x3a7   :  { %v1533_v61 = vpop.f32.mrb[44].mxu1 }
 0x3a8   :  { %v1117_v62 = vadd.f32 %v1533_v61, %v2040_v38  ;;  %v1108_v63 = vpop.f32.mrb[45].mxu1 }
 0x3a9   :  { %v1109_v1 = vadd.f32 %v2040_v38, %v1108_v63  ;;  %v1534_v2 = vpop.f32.mrb[46].mxu1 }
 0x3aa   :  { %1201 = vst [vmem:[%s2180_s9 + $0x70] sm:$0xff] %v1117_v62  ;;  %v1120_v3 = vadd.f32 %v1534_v2, %v2040_v38  ;;  %v1111_v4 = vpop.f32.mrb[47].mxu1 }
 0x3ab   :  { %1199 = vst [vmem:[%s2180_s9 + $0x60] sm:$0xff] %v1109_v1  ;;  %v1112_v5 = vadd.f32 %v2040_v38, %v1111_v4 }
 0x3ac   :  { %1202 = vst [vmem:[%s2180_s9 + $0x78] sm:$0xff] %v1120_v3 }
 0x3ad   :  { %1200 = vst [vmem:[%s2180_s9 + $0x68] sm:$0xff] %v1112_v5 }
 0x3af   :  { %v1537_v6 = vpop.f32.mrb[48].mxu1 }
 0x3b0   :  { %v1133_v8 = vadd.f32 %v1537_v6, %v2040_v38  ;;  %v1124_v9 = vpop.f32.mrb[49].mxu1 }
 0x3b1   :  { %v1125_v10 = vadd.f32 %v2040_v38, %v1124_v9  ;;  %v1538_v11 = vpop.f32.mrb[50].mxu1 }
 0x3b2   :  { %1205 = vst [vmem:[%s2180_s9 + $0x90] sm:$0xff] %v1133_v8  ;;  %v1136_v12 = vadd.f32 %v1538_v11, %v2040_v38  ;;  %v1127_v13 = vpop.f32.mrb[51].mxu1 }
 0x3b3   :  { %1203 = vst [vmem:[%s2180_s9 + $0x80] sm:$0xff] %v1125_v10  ;;  %v1128_v14 = vadd.f32 %v2040_v38, %v1127_v13 }
 0x3b4   :  { %1206 = vst [vmem:[%s2180_s9 + $0x98] sm:$0xff] %v1136_v12 }
 0x3b5   :  { %1204 = vst [vmem:[%s2180_s9 + $0x88] sm:$0xff] %v1128_v14 }
 0x3b7   :  { %v1541_v15 = vpop.f32.mrb[52].mxu1 }
 0x3b8   :  { %v1149_v16 = vadd.f32 %v1541_v15, %v2040_v38  ;;  %v1140_v17 = vpop.f32.mrb[53].mxu1 }
 0x3b9   :  { %v1141_v18 = vadd.f32 %v2040_v38, %v1140_v17  ;;  %v1542_v19 = vpop.f32.mrb[54].mxu1 }
 0x3ba   :  { %1209 = vst [vmem:[%s2180_s9 + $0xb0] sm:$0xff] %v1149_v16  ;;  %v1152_v20 = vadd.f32 %v1542_v19, %v2040_v38  ;;  %v1143_v21 = vpop.f32.mrb[55].mxu1 }
 0x3bb   :  { %1207 = vst [vmem:[%s2180_s9 + $0xa0] sm:$0xff] %v1141_v18  ;;  %v1144_v22 = vadd.f32 %v2040_v38, %v1143_v21 }
 0x3bc   :  { %1210 = vst [vmem:[%s2180_s9 + $0xb8] sm:$0xff] %v1152_v20 }
 0x3bd   :  { %1208 = vst [vmem:[%s2180_s9 + $0xa8] sm:$0xff] %v1144_v22 }
 0x3bf   :  { %v1545_v23 = vpop.f32.mrb[56].mxu1 }
 0x3c0   :  { %v1165_v24 = vadd.f32 %v1545_v23, %v2040_v38  ;;  %v1156_v25 = vpop.f32.mrb[57].mxu1 }
 0x3c1   :  { %v1157_v26 = vadd.f32 %v2040_v38, %v1156_v25  ;;  %v1546_v27 = vpop.f32.mrb[58].mxu1 }
 0x3c2   :  { %1213 = vst [vmem:[%s2180_s9 + $0xd0] sm:$0xff] %v1165_v24  ;;  %v1168_v28 = vadd.f32 %v1546_v27, %v2040_v38  ;;  %v1159_v29 = vpop.f32.mrb[59].mxu1 }
 0x3c3   :  { %1211 = vst [vmem:[%s2180_s9 + $0xc0] sm:$0xff] %v1157_v26  ;;  %v1160_v30 = vadd.f32 %v2040_v38, %v1159_v29 }
 0x3c4   :  { %1214 = vst [vmem:[%s2180_s9 + $0xd8] sm:$0xff] %v1168_v28 }
 0x3c5   :  { %1212 = vst [vmem:[%s2180_s9 + $0xc8] sm:$0xff] %v1160_v30 }
 0x3c7   :  { %v1549_v31 = vpop.f32.mrb[60].mxu1 }
 0x3c8   :  { %v1181_v32 = vadd.f32 %v1549_v31, %v2040_v38  ;;  %v1172_v33 = vpop.f32.mrb[61].mxu1 }
 0x3c9   :  { %v1173_v34 = vadd.f32 %v2040_v38, %v1172_v33  ;;  %v1550_v35 = vpop.f32.mrb[62].mxu1 }
 0x3ca   :  { %1217 = vst [vmem:[%s2180_s9 + $0xf0] sm:$0xff] %v1181_v32  ;;  %v1184_v36 = vadd.f32 %v1550_v35, %v2040_v38  ;;  %v1175_v37 = vpop.f32.mrb[63].mxu1 }
 0x3cb   :  { %1215 = vst [vmem:[%s2180_s9 + $0xe0] sm:$0xff] %v1173_v34  ;;  %v1176_v39 = vadd.f32 %v2040_v38, %v1175_v37 }
 0x3cc   :  { %1218 = vst [vmem:[%s2180_s9 + $0xf8] sm:$0xff] %v1184_v36 }
 0x3cd   :  { %1216 = vst [vmem:[%s2180_s9 + $0xe8] sm:$0xff] %v1176_v39 }

</bundles_post_ra>
